<compile_context>
chip_gen: v6e
topology: v6e:2x2x1
jax: 0.10.0
libtpu: 0.0.40
codegen_flags: <defaults>
</compile_context>

<pallas_src>
import jax
import jax.numpy as jnp
from jax import lax
from jax.experimental import pallas as pl
from jax.experimental.pallas import tpu as pltpu

NUM_LABELS = 63             # hard-coded in the PyTorch module
_LANE = 128                 # TPU lane width
_RELAYOUT_UNROLL_MAX = 256  # static-unroll threshold for the relayout loop


def _gac_fused_kernel(x_ref, s_ref, w_ref, b_ref, out_ref, a2_ref, bmat_ref):
    """Fused: relu(x @ W + b) -> row-major view(F, 63) -> S_pad @ B_pad^T."""
    f = w_ref.shape[1]          # out_features (static)
    n_pad = bmat_ref.shape[0]   # out_features rounded up to a lane multiple
    L = NUM_LABELS

    # ---- MLP on the MXU: bf16 inputs, f32 accumulation ----------------------
    acc = jnp.dot(x_ref[...], w_ref[...], preferred_element_type=jnp.float32)
    # relu(+bias) goes straight into the staging ref so no (63, F) f32 value
    # stays live across the relayout (bounds vreg pressure at large F).
    a2_ref[:, 0:f] = jnp.maximum(acc + b_ref[...], 0.0)

    # ---- staging tail: 128 slack columns so every relayout read below is a
    #      full unmasked 128-lane slab.  a2[p, c] must equal A_flat[p*F + c]
    #      for c < F + 63 (B rows that wrap an A-row boundary) and merely be
    #      FINITE for c < F + 128 (don't-care lanes contracting against the
    #      zero-padded S columns).
    a2_ref[:, f:f + _LANE] = jnp.zeros((L, _LANE), jnp.float32)   # finite filler
    a2_ref[0:L - 1, f:f + L] = a2_ref[1:L, 0:L]                   # wrap rows
    # (row 62's tail is only ever read as don't-care lanes -> stays zero; the
    #  old dead duplicate store of that row is gone.)

    # ---- row-major reinterpret (63, F) -> B (F, 63), padded to (Npad, 128) --
    # B[m, j] = A_flat[63*m + j] = a2[p0, c0 + j], (p0, c0) = divmod(63*m, F).
    if f <= _RELAYOUT_UNROLL_MAX:
        for m in range(f):                      # static, unrolled at trace time
            p0, c0 = divmod(L * m, f)
            bmat_ref[m:m + 1, :] = a2_ref[p0:p0 + 1, c0:c0 + _LANE]
    else:
        # O(1) code size for large F (the loop is store/XLU bound, not branch bound).
        def body(m, carry):
            p0 = (L * m) // f
            c0 = L * m - p0 * f
            bmat_ref[pl.ds(m, 1), :] = a2_ref[pl.ds(p0, 1), pl.ds(c0, _LANE)]
            return carry
        lax.fori_loop(0, f, body, 0)
    if n_pad > f:                               # keep padded B rows finite
        bmat_ref[f:n_pad, :] = jnp.zeros((n_pad - f, _LANE), jnp.float32)

    # ---- out = S_pad @ B_pad^T: contract the last axis of both operands so no
    #      transpose of bmat is materialized; f32 x f32 directly (no whole-array
    #      bf16 repack pass before the MXU).
    out_ref[...] = lax.dot_general(
        s_ref[...], bmat_ref[...],
        dimension_numbers=(((1,), (1,)), ((), ())),
        preferred_element_type=jnp.float32,
    ).astype(out_ref.dtype)


def gac_forward(label, s, w, b):
    """label: anything reshaping to (63, in_features), s: (63, 63),
    w: (in_features, out_features) (torch weight pre-transposed),
    b: (out_features,) or (1, out_features).  Returns (63, out_features) f32."""
    in_dims, out_dims = w.shape
    x = label.reshape(-1, in_dims)
    assert x.shape[0] == NUM_LABELS, "GAC assumes 63 labels"
    assert s.shape == (NUM_LABELS, NUM_LABELS)
    # TODO(synk): out_features < 63 would need 2-piece relayout windows; the
    # single-slab construction requires out_features >= 63 (true for the model).
    assert out_dims >= NUM_LABELS
    n_pad = -(-out_dims // _LANE) * _LANE       # round output width up to lanes

    # bf16 MXU operands for the only large input stream; bias stays f32.
    x_bf = x.astype(jnp.bfloat16)
    w_bf = w.astype(jnp.bfloat16)
    b_f32 = jnp.reshape(b, (1, out_dims)).astype(jnp.float32)
    # Zero-pad S to 128 lanes: don't-care slab lanes of B contract against 0.
    # (S is 63x63 -> keeping it f32 costs ~nothing and the 2nd matmul stays f32.)
    s_pad = jnp.pad(s.astype(jnp.float32), ((0, 0), (0, _LANE - NUM_LABELS)))

    flops = 2 * (NUM_LABELS * in_dims * out_dims + NUM_LABELS * _LANE * n_pad)
    bytes_accessed = (2 * (x_bf.size + w_bf.size)
                      + 4 * (s_pad.size + b_f32.size + NUM_LABELS * n_pad))

    vmem = pl.BlockSpec(memory_space=pltpu.MemorySpace.VMEM)
    out_padded = pl.pallas_call(
        _gac_fused_kernel,
        out_shape=jax.ShapeDtypeStruct((NUM_LABELS, n_pad), jnp.float32),
        in_specs=[vmem, vmem, vmem, vmem],
        out_specs=vmem,
        scratch_shapes=[
            pltpu.VMEM((NUM_LABELS, out_dims + _LANE), jnp.float32),  # A + slack
            pltpu.VMEM((n_pad, _LANE), jnp.float32),                  # B (padded)
        ],
        cost_estimate=pl.CostEstimate(
            flops=flops, transcendentals=0, bytes_accessed=bytes_accessed),
    )(x_bf, s_pad, w_bf, b_f32)
    return out_padded[:, :out_dims]


if __name__ == "__main__":
    in_features = 32
    out_features = 64   # F; lane-padded to 128 inside the wrapper

    key = jax.random.PRNGKey(0)
    k_w, k_label, k_s = jax.random.split(key, 3)

    # Parameter init matching the module: weight ~ U(-1/sqrt(in), 1/sqrt(in)),
    # bias = 0; weight stored pre-transposed as (in, out) so the kernel does x @ W.
    stdv = 1.0 / (in_features ** 0.5)
    w = jax.random.uniform(k_w, (in_features, out_features), jnp.float32,
                           minval=-stdv, maxval=stdv)
    b = jnp.zeros((1, out_features), jnp.float32)

    label = jax.random.normal(k_label, (NUM_LABELS, in_features), jnp.float32)
    s = jax.random.normal(k_s, (NUM_LABELS, NUM_LABELS), jnp.float32)

    fwd = jax.jit(gac_forward)
    out = jax.block_until_ready(fwd(label, s, w, b))
    assert out.shape == (NUM_LABELS, out_features)

    hp = lax.Precision.HIGHEST

    # Reference 1: mirrors kernel numerics (bf16 first-matmul inputs, f32 after).
    lb = label.astype(jnp.bfloat16).astype(jnp.float32)
    wb = w.astype(jnp.bfloat16).astype(jnp.float32)
    a_q = jnp.maximum(jnp.dot(lb, wb, precision=hp) + b, 0.0)
    ref_matched = jnp.dot(s, a_q.reshape(out_features, NUM_LABELS).T, precision=hp)

    # Reference 2: pure-f32 torch-equivalent forward.
    a32 = jnp.maximum(jnp.dot(label, w, precision=hp) + b, 0.0)
    ref_f32 = jnp.dot(s, a32.reshape(out_features, NUM_LABELS).T, precision=hp)

    err_m = float(jnp.max(jnp.abs(out - ref_matched)))
    err_f = float(jnp.max(jnp.abs(out - ref_f32)))
    assert jnp.allclose(out, ref_matched, atol=5e-2, rtol=5e-2), err_m
    assert jnp.allclose(out, ref_f32, atol=1e-1, rtol=1e-1), err_f

    print("KERNEL_OK")
</pallas_src>

<mosaic_0001>
module attributes {stable_mosaic.version = 11 : i64} {
  func.func @_gac_fused_kernel(%arg0: memref<63x32xbf16, #tpu.memory_space<vmem>>, %arg1: memref<63x128xf32, #tpu.memory_space<vmem>>, %arg2: memref<32x64xbf16, #tpu.memory_space<vmem>>, %arg3: memref<1x64xf32, #tpu.memory_space<vmem>>, %arg4: memref<63x128xf32, #tpu.memory_space<vmem>>, %arg5: memref<63x192xf32, #tpu.memory_space<vmem>>, %arg6: memref<128x128xf32, #tpu.memory_space<vmem>>) attributes {dimension_semantics = [], scalar_prefetch = 0 : i64, scratch_operands = 2 : i64, tpu.core_type = #tpu.core_type<tc>} {
    %c0 = arith.constant 0 : index
    %c0_0 = arith.constant 0 : index
    %0 = vector.load %arg0[%c0, %c0_0] : memref<63x32xbf16, #tpu.memory_space<vmem>>, vector<63x32xbf16>
    %c0_1 = arith.constant 0 : index
    %c0_2 = arith.constant 0 : index
    %1 = vector.load %arg2[%c0_1, %c0_2] : memref<32x64xbf16, #tpu.memory_space<vmem>>, vector<32x64xbf16>
    %cst = arith.constant dense<0.000000e+00> : vector<63x64xf32>
    %2 = tpu.matmul %0, %1, %cst {dimension_numbers = #tpu.dot_dimension_numbers<[1], [0], [0], [1], [0, 0, 1, 1], [], []>} : vector<63x32xbf16>, vector<32x64xbf16>, vector<63x64xf32> -> vector<63x64xf32>
    %c0_3 = arith.constant 0 : index
    %c0_4 = arith.constant 0 : index
    %3 = vector.load %arg3[%c0_3, %c0_4] : memref<1x64xf32, #tpu.memory_space<vmem>>, vector<1x64xf32>
    %4 = vector.broadcast %3 : vector<1x64xf32> to vector<63x64xf32>
    %5 = arith.addf %2, %4 : vector<63x64xf32>
    %cst_5 = arith.constant 0.000000e+00 : f32
    %6 = vector.broadcast %cst_5 : f32 to vector<63x64xf32>
    %7 = arith.maximumf %5, %6 : vector<63x64xf32>
    %c0_6 = arith.constant 0 : index
    %c0_7 = arith.constant 0 : index
    %8 = vector.load %arg5[%c0_6, %c0_7] : memref<63x192xf32, #tpu.memory_space<vmem>>, vector<63x64xf32>
    tpu.vector_store %arg5[%c0_6, %c0_7], %7 {strides = array<i32>} : memref<63x192xf32, #tpu.memory_space<vmem>>, vector<63x64xf32>,
    %cst_8 = arith.constant 0.000000e+00 : f32
    %9 = vector.broadcast %cst_8 : f32 to vector<63x128xf32>
    %c0_9 = arith.constant 0 : index
    %c64 = arith.constant 64 : index
    %10 = vector.load %arg5[%c0_9, %c64] : memref<63x192xf32, #tpu.memory_space<vmem>>, vector<63x128xf32>
    tpu.vector_store %arg5[%c0_9, %c64], %9 {strides = array<i32>} : memref<63x192xf32, #tpu.memory_space<vmem>>, vector<63x128xf32>,
    %c1 = arith.constant 1 : index
    %c0_10 = arith.constant 0 : index
    %11 = vector.load %arg5[%c1, %c0_10] : memref<63x192xf32, #tpu.memory_space<vmem>>, vector<62x63xf32>
    %c0_11 = arith.constant 0 : index
    %c64_12 = arith.constant 64 : index
    %12 = vector.load %arg5[%c0_11, %c64_12] : memref<63x192xf32, #tpu.memory_space<vmem>>, vector<62x63xf32>
    tpu.vector_store %arg5[%c0_11, %c64_12], %11 {strides = array<i32>} : memref<63x192xf32, #tpu.memory_space<vmem>>, vector<62x63xf32>,
    %c0_13 = arith.constant 0 : index
    %c0_14 = arith.constant 0 : index
    %13 = vector.load %arg5[%c0_13, %c0_14] : memref<63x192xf32, #tpu.memory_space<vmem>>, vector<1x128xf32>
    %c0_15 = arith.constant 0 : index
    %c0_16 = arith.constant 0 : index
    %14 = vector.load %arg6[%c0_15, %c0_16] : memref<128x128xf32, #tpu.memory_space<vmem>>, vector<1x128xf32>
    tpu.vector_store %arg6[%c0_15, %c0_16], %13 {strides = array<i32>} : memref<128x128xf32, #tpu.memory_space<vmem>>, vector<1x128xf32>,
    %c0_17 = arith.constant 0 : index
    %c63 = arith.constant 63 : index
    %15 = vector.load %arg5[%c0_17, %c63] : memref<63x192xf32, #tpu.memory_space<vmem>>, vector<1x128xf32>
    %c1_18 = arith.constant 1 : index
    %c0_19 = arith.constant 0 : index
    %16 = vector.load %arg6[%c1_18, %c0_19] : memref<128x128xf32, #tpu.memory_space<vmem>>, vector<1x128xf32>
    tpu.vector_store %arg6[%c1_18, %c0_19], %15 {strides = array<i32>} : memref<128x128xf32, #tpu.memory_space<vmem>>, vector<1x128xf32>,
    %c1_20 = arith.constant 1 : index
    %c62 = arith.constant 62 : index
    %17 = vector.load %arg5[%c1_20, %c62] : memref<63x192xf32, #tpu.memory_space<vmem>>, vector<1x128xf32>
    %c2 = arith.constant 2 : index
    %c0_21 = arith.constant 0 : index
    %18 = vector.load %arg6[%c2, %c0_21] : memref<128x128xf32, #tpu.memory_space<vmem>>, vector<1x128xf32>
    tpu.vector_store %arg6[%c2, %c0_21], %17 {strides = array<i32>} : memref<128x128xf32, #tpu.memory_space<vmem>>, vector<1x128xf32>,
    %c2_22 = arith.constant 2 : index
    %c61 = arith.constant 61 : index
    %19 = vector.load %arg5[%c2_22, %c61] : memref<63x192xf32, #tpu.memory_space<vmem>>, vector<1x128xf32>
    %c3 = arith.constant 3 : index
    %c0_23 = arith.constant 0 : index
    %20 = vector.load %arg6[%c3, %c0_23] : memref<128x128xf32, #tpu.memory_space<vmem>>, vector<1x128xf32>
    tpu.vector_store %arg6[%c3, %c0_23], %19 {strides = array<i32>} : memref<128x128xf32, #tpu.memory_space<vmem>>, vector<1x128xf32>,
    %c3_24 = arith.constant 3 : index
    %c60 = arith.constant 60 : index
    %21 = vector.load %arg5[%c3_24, %c60] : memref<63x192xf32, #tpu.memory_space<vmem>>, vector<1x128xf32>
    %c4 = arith.constant 4 : index
    %c0_25 = arith.constant 0 : index
    %22 = vector.load %arg6[%c4, %c0_25] : memref<128x128xf32, #tpu.memory_space<vmem>>, vector<1x128xf32>
    tpu.vector_store %arg6[%c4, %c0_25], %21 {strides = array<i32>} : memref<128x128xf32, #tpu.memory_space<vmem>>, vector<1x128xf32>,
    %c4_26 = arith.constant 4 : index
    %c59 = arith.constant 59 : index
    %23 = vector.load %arg5[%c4_26, %c59] : memref<63x192xf32, #tpu.memory_space<vmem>>, vector<1x128xf32>
    %c5 = arith.constant 5 : index
    %c0_27 = arith.constant 0 : index
    %24 = vector.load %arg6[%c5, %c0_27] : memref<128x128xf32, #tpu.memory_space<vmem>>, vector<1x128xf32>
    tpu.vector_store %arg6[%c5, %c0_27], %23 {strides = array<i32>} : memref<128x128xf32, #tpu.memory_space<vmem>>, vector<1x128xf32>,
    %c5_28 = arith.constant 5 : index
    %c58 = arith.constant 58 : index
    %25 = vector.load %arg5[%c5_28, %c58] : memref<63x192xf32, #tpu.memory_space<vmem>>, vector<1x128xf32>
    %c6 = arith.constant 6 : index
    %c0_29 = arith.constant 0 : index
    %26 = vector.load %arg6[%c6, %c0_29] : memref<128x128xf32, #tpu.memory_space<vmem>>, vector<1x128xf32>
    tpu.vector_store %arg6[%c6, %c0_29], %25 {strides = array<i32>} : memref<128x128xf32, #tpu.memory_space<vmem>>, vector<1x128xf32>,
    %c6_30 = arith.constant 6 : index
    %c57 = arith.constant 57 : index
    %27 = vector.load %arg5[%c6_30, %c57] : memref<63x192xf32, #tpu.memory_space<vmem>>, vector<1x128xf32>
    %c7 = arith.constant 7 : index
    %c0_31 = arith.constant 0 : index
    %28 = vector.load %arg6[%c7, %c0_31] : memref<128x128xf32, #tpu.memory_space<vmem>>, vector<1x128xf32>
    tpu.vector_store %arg6[%c7, %c0_31], %27 {strides = array<i32>} : memref<128x128xf32, #tpu.memory_space<vmem>>, vector<1x128xf32>,
    %c7_32 = arith.constant 7 : index
    %c56 = arith.constant 56 : index
    %29 = vector.load %arg5[%c7_32, %c56] : memref<63x192xf32, #tpu.memory_space<vmem>>, vector<1x128xf32>
    %c8 = arith.constant 8 : index
    %c0_33 = arith.constant 0 : index
    %30 = vector.load %arg6[%c8, %c0_33] : memref<128x128xf32, #tpu.memory_space<vmem>>, vector<1x128xf32>
    tpu.vector_store %arg6[%c8, %c0_33], %29 {strides = array<i32>} : memref<128x128xf32, #tpu.memory_space<vmem>>, vector<1x128xf32>,
    %c8_34 = arith.constant 8 : index
    %c55 = arith.constant 55 : index
    %31 = vector.load %arg5[%c8_34, %c55] : memref<63x192xf32, #tpu.memory_space<vmem>>, vector<1x128xf32>
    %c9 = arith.constant 9 : index
    %c0_35 = arith.constant 0 : index
    %32 = vector.load %arg6[%c9, %c0_35] : memref<128x128xf32, #tpu.memory_space<vmem>>, vector<1x128xf32>
    tpu.vector_store %arg6[%c9, %c0_35], %31 {strides = array<i32>} : memref<128x128xf32, #tpu.memory_space<vmem>>, vector<1x128xf32>,
    %c9_36 = arith.constant 9 : index
    %c54 = arith.constant 54 : index
    %33 = vector.load %arg5[%c9_36, %c54] : memref<63x192xf32, #tpu.memory_space<vmem>>, vector<1x128xf32>
    %c10 = arith.constant 10 : index
    %c0_37 = arith.constant 0 : index
    %34 = vector.load %arg6[%c10, %c0_37] : memref<128x128xf32, #tpu.memory_space<vmem>>, vector<1x128xf32>
    tpu.vector_store %arg6[%c10, %c0_37], %33 {strides = array<i32>} : memref<128x128xf32, #tpu.memory_space<vmem>>, vector<1x128xf32>,
    %c10_38 = arith.constant 10 : index
    %c53 = arith.constant 53 : index
    %35 = vector.load %arg5[%c10_38, %c53] : memref<63x192xf32, #tpu.memory_space<vmem>>, vector<1x128xf32>
    %c11 = arith.constant 11 : index
    %c0_39 = arith.constant 0 : index
    %36 = vector.load %arg6[%c11, %c0_39] : memref<128x128xf32, #tpu.memory_space<vmem>>, vector<1x128xf32>
    tpu.vector_store %arg6[%c11, %c0_39], %35 {strides = array<i32>} : memref<128x128xf32, #tpu.memory_space<vmem>>, vector<1x128xf32>,
    %c11_40 = arith.constant 11 : index
    %c52 = arith.constant 52 : index
    %37 = vector.load %arg5[%c11_40, %c52] : memref<63x192xf32, #tpu.memory_space<vmem>>, vector<1x128xf32>
    %c12 = arith.constant 12 : index
    %c0_41 = arith.constant 0 : index
    %38 = vector.load %arg6[%c12, %c0_41] : memref<128x128xf32, #tpu.memory_space<vmem>>, vector<1x128xf32>
    tpu.vector_store %arg6[%c12, %c0_41], %37 {strides = array<i32>} : memref<128x128xf32, #tpu.memory_space<vmem>>, vector<1x128xf32>,
    %c12_42 = arith.constant 12 : index
    %c51 = arith.constant 51 : index
    %39 = vector.load %arg5[%c12_42, %c51] : memref<63x192xf32, #tpu.memory_space<vmem>>, vector<1x128xf32>
    %c13 = arith.constant 13 : index
    %c0_43 = arith.constant 0 : index
    %40 = vector.load %arg6[%c13, %c0_43] : memref<128x128xf32, #tpu.memory_space<vmem>>, vector<1x128xf32>
    tpu.vector_store %arg6[%c13, %c0_43], %39 {strides = array<i32>} : memref<128x128xf32, #tpu.memory_space<vmem>>, vector<1x128xf32>,
    %c13_44 = arith.constant 13 : index
    %c50 = arith.constant 50 : index
    %41 = vector.load %arg5[%c13_44, %c50] : memref<63x192xf32, #tpu.memory_space<vmem>>, vector<1x128xf32>
    %c14 = arith.constant 14 : index
    %c0_45 = arith.constant 0 : index
    %42 = vector.load %arg6[%c14, %c0_45] : memref<128x128xf32, #tpu.memory_space<vmem>>, vector<1x128xf32>
    tpu.vector_store %arg6[%c14, %c0_45], %41 {strides = array<i32>} : memref<128x128xf32, #tpu.memory_space<vmem>>, vector<1x128xf32>,
    %c14_46 = arith.constant 14 : index
    %c49 = arith.constant 49 : index
    %43 = vector.load %arg5[%c14_46, %c49] : memref<63x192xf32, #tpu.memory_space<vmem>>, vector<1x128xf32>
    %c15 = arith.constant 15 : index
    %c0_47 = arith.constant 0 : index
    %44 = vector.load %arg6[%c15, %c0_47] : memref<128x128xf32, #tpu.memory_space<vmem>>, vector<1x128xf32>
    tpu.vector_store %arg6[%c15, %c0_47], %43 {strides = array<i32>} : memref<128x128xf32, #tpu.memory_space<vmem>>, vector<1x128xf32>,
    %c15_48 = arith.constant 15 : index
    %c48 = arith.constant 48 : index
    %45 = vector.load %arg5[%c15_48, %c48] : memref<63x192xf32, #tpu.memory_space<vmem>>, vector<1x128xf32>
    %c16 = arith.constant 16 : index
    %c0_49 = arith.constant 0 : index
    %46 = vector.load %arg6[%c16, %c0_49] : memref<128x128xf32, #tpu.memory_space<vmem>>, vector<1x128xf32>
    tpu.vector_store %arg6[%c16, %c0_49], %45 {strides = array<i32>} : memref<128x128xf32, #tpu.memory_space<vmem>>, vector<1x128xf32>,
    %c16_50 = arith.constant 16 : index
    %c47 = arith.constant 47 : index
    %47 = vector.load %arg5[%c16_50, %c47] : memref<63x192xf32, #tpu.memory_space<vmem>>, vector<1x128xf32>
    %c17 = arith.constant 17 : index
    %c0_51 = arith.constant 0 : index
    %48 = vector.load %arg6[%c17, %c0_51] : memref<128x128xf32, #tpu.memory_space<vmem>>, vector<1x128xf32>
    tpu.vector_store %arg6[%c17, %c0_51], %47 {strides = array<i32>} : memref<128x128xf32, #tpu.memory_space<vmem>>, vector<1x128xf32>,
    %c17_52 = arith.constant 17 : index
    %c46 = arith.constant 46 : index
    %49 = vector.load %arg5[%c17_52, %c46] : memref<63x192xf32, #tpu.memory_space<vmem>>, vector<1x128xf32>
    %c18 = arith.constant 18 : index
    %c0_53 = arith.constant 0 : index
    %50 = vector.load %arg6[%c18, %c0_53] : memref<128x128xf32, #tpu.memory_space<vmem>>, vector<1x128xf32>
    tpu.vector_store %arg6[%c18, %c0_53], %49 {strides = array<i32>} : memref<128x128xf32, #tpu.memory_space<vmem>>, vector<1x128xf32>,
    %c18_54 = arith.constant 18 : index
    %c45 = arith.constant 45 : index
    %51 = vector.load %arg5[%c18_54, %c45] : memref<63x192xf32, #tpu.memory_space<vmem>>, vector<1x128xf32>
    %c19 = arith.constant 19 : index
    %c0_55 = arith.constant 0 : index
    %52 = vector.load %arg6[%c19, %c0_55] : memref<128x128xf32, #tpu.memory_space<vmem>>, vector<1x128xf32>
    tpu.vector_store %arg6[%c19, %c0_55], %51 {strides = array<i32>} : memref<128x128xf32, #tpu.memory_space<vmem>>, vector<1x128xf32>,
    %c19_56 = arith.constant 19 : index
    %c44 = arith.constant 44 : index
    %53 = vector.load %arg5[%c19_56, %c44] : memref<63x192xf32, #tpu.memory_space<vmem>>, vector<1x128xf32>
    %c20 = arith.constant 20 : index
    %c0_57 = arith.constant 0 : index
    %54 = vector.load %arg6[%c20, %c0_57] : memref<128x128xf32, #tpu.memory_space<vmem>>, vector<1x128xf32>
    tpu.vector_store %arg6[%c20, %c0_57], %53 {strides = array<i32>} : memref<128x128xf32, #tpu.memory_space<vmem>>, vector<1x128xf32>,
    %c20_58 = arith.constant 20 : index
    %c43 = arith.constant 43 : index
    %55 = vector.load %arg5[%c20_58, %c43] : memref<63x192xf32, #tpu.memory_space<vmem>>, vector<1x128xf32>
    %c21 = arith.constant 21 : index
    %c0_59 = arith.constant 0 : index
    %56 = vector.load %arg6[%c21, %c0_59] : memref<128x128xf32, #tpu.memory_space<vmem>>, vector<1x128xf32>
    tpu.vector_store %arg6[%c21, %c0_59], %55 {strides = array<i32>} : memref<128x128xf32, #tpu.memory_space<vmem>>, vector<1x128xf32>,
    %c21_60 = arith.constant 21 : index
    %c42 = arith.constant 42 : index
    %57 = vector.load %arg5[%c21_60, %c42] : memref<63x192xf32, #tpu.memory_space<vmem>>, vector<1x128xf32>
    %c22 = arith.constant 22 : index
    %c0_61 = arith.constant 0 : index
    %58 = vector.load %arg6[%c22, %c0_61] : memref<128x128xf32, #tpu.memory_space<vmem>>, vector<1x128xf32>
    tpu.vector_store %arg6[%c22, %c0_61], %57 {strides = array<i32>} : memref<128x128xf32, #tpu.memory_space<vmem>>, vector<1x128xf32>,
    %c22_62 = arith.constant 22 : index
    %c41 = arith.constant 41 : index
    %59 = vector.load %arg5[%c22_62, %c41] : memref<63x192xf32, #tpu.memory_space<vmem>>, vector<1x128xf32>
    %c23 = arith.constant 23 : index
    %c0_63 = arith.constant 0 : index
    %60 = vector.load %arg6[%c23, %c0_63] : memref<128x128xf32, #tpu.memory_space<vmem>>, vector<1x128xf32>
    tpu.vector_store %arg6[%c23, %c0_63], %59 {strides = array<i32>} : memref<128x128xf32, #tpu.memory_space<vmem>>, vector<1x128xf32>,
    %c23_64 = arith.constant 23 : index
    %c40 = arith.constant 40 : index
    %61 = vector.load %arg5[%c23_64, %c40] : memref<63x192xf32, #tpu.memory_space<vmem>>, vector<1x128xf32>
    %c24 = arith.constant 24 : index
    %c0_65 = arith.constant 0 : index
    %62 = vector.load %arg6[%c24, %c0_65] : memref<128x128xf32, #tpu.memory_space<vmem>>, vector<1x128xf32>
    tpu.vector_store %arg6[%c24, %c0_65], %61 {strides = array<i32>} : memref<128x128xf32, #tpu.memory_space<vmem>>, vector<1x128xf32>,
    %c24_66 = arith.constant 24 : index
    %c39 = arith.constant 39 : index
    %63 = vector.load %arg5[%c24_66, %c39] : memref<63x192xf32, #tpu.memory_space<vmem>>, vector<1x128xf32>
    %c25 = arith.constant 25 : index
    %c0_67 = arith.constant 0 : index
    %64 = vector.load %arg6[%c25, %c0_67] : memref<128x128xf32, #tpu.memory_space<vmem>>, vector<1x128xf32>
    tpu.vector_store %arg6[%c25, %c0_67], %63 {strides = array<i32>} : memref<128x128xf32, #tpu.memory_space<vmem>>, vector<1x128xf32>,
    %c25_68 = arith.constant 25 : index
    %c38 = arith.constant 38 : index
    %65 = vector.load %arg5[%c25_68, %c38] : memref<63x192xf32, #tpu.memory_space<vmem>>, vector<1x128xf32>
    %c26 = arith.constant 26 : index
    %c0_69 = arith.constant 0 : index
    %66 = vector.load %arg6[%c26, %c0_69] : memref<128x128xf32, #tpu.memory_space<vmem>>, vector<1x128xf32>
    tpu.vector_store %arg6[%c26, %c0_69], %65 {strides = array<i32>} : memref<128x128xf32, #tpu.memory_space<vmem>>, vector<1x128xf32>,
    %c26_70 = arith.constant 26 : index
    %c37 = arith.constant 37 : index
    %67 = vector.load %arg5[%c26_70, %c37] : memref<63x192xf32, #tpu.memory_space<vmem>>, vector<1x128xf32>
    %c27 = arith.constant 27 : index
    %c0_71 = arith.constant 0 : index
    %68 = vector.load %arg6[%c27, %c0_71] : memref<128x128xf32, #tpu.memory_space<vmem>>, vector<1x128xf32>
    tpu.vector_store %arg6[%c27, %c0_71], %67 {strides = array<i32>} : memref<128x128xf32, #tpu.memory_space<vmem>>, vector<1x128xf32>,
    %c27_72 = arith.constant 27 : index
    %c36 = arith.constant 36 : index
    %69 = vector.load %arg5[%c27_72, %c36] : memref<63x192xf32, #tpu.memory_space<vmem>>, vector<1x128xf32>
    %c28 = arith.constant 28 : index
    %c0_73 = arith.constant 0 : index
    %70 = vector.load %arg6[%c28, %c0_73] : memref<128x128xf32, #tpu.memory_space<vmem>>, vector<1x128xf32>
    tpu.vector_store %arg6[%c28, %c0_73], %69 {strides = array<i32>} : memref<128x128xf32, #tpu.memory_space<vmem>>, vector<1x128xf32>,
    %c28_74 = arith.constant 28 : index
    %c35 = arith.constant 35 : index
    %71 = vector.load %arg5[%c28_74, %c35] : memref<63x192xf32, #tpu.memory_space<vmem>>, vector<1x128xf32>
    %c29 = arith.constant 29 : index
    %c0_75 = arith.constant 0 : index
    %72 = vector.load %arg6[%c29, %c0_75] : memref<128x128xf32, #tpu.memory_space<vmem>>, vector<1x128xf32>
    tpu.vector_store %arg6[%c29, %c0_75], %71 {strides = array<i32>} : memref<128x128xf32, #tpu.memory_space<vmem>>, vector<1x128xf32>,
    %c29_76 = arith.constant 29 : index
    %c34 = arith.constant 34 : index
    %73 = vector.load %arg5[%c29_76, %c34] : memref<63x192xf32, #tpu.memory_space<vmem>>, vector<1x128xf32>
    %c30 = arith.constant 30 : index
    %c0_77 = arith.constant 0 : index
    %74 = vector.load %arg6[%c30, %c0_77] : memref<128x128xf32, #tpu.memory_space<vmem>>, vector<1x128xf32>
    tpu.vector_store %arg6[%c30, %c0_77], %73 {strides = array<i32>} : memref<128x128xf32, #tpu.memory_space<vmem>>, vector<1x128xf32>,
    %c30_78 = arith.constant 30 : index
    %c33 = arith.constant 33 : index
    %75 = vector.load %arg5[%c30_78, %c33] : memref<63x192xf32, #tpu.memory_space<vmem>>, vector<1x128xf32>
    %c31 = arith.constant 31 : index
    %c0_79 = arith.constant 0 : index
    %76 = vector.load %arg6[%c31, %c0_79] : memref<128x128xf32, #tpu.memory_space<vmem>>, vector<1x128xf32>
    tpu.vector_store %arg6[%c31, %c0_79], %75 {strides = array<i32>} : memref<128x128xf32, #tpu.memory_space<vmem>>, vector<1x128xf32>,
    %c31_80 = arith.constant 31 : index
    %c32 = arith.constant 32 : index
    %77 = vector.load %arg5[%c31_80, %c32] : memref<63x192xf32, #tpu.memory_space<vmem>>, vector<1x128xf32>
    %c32_81 = arith.constant 32 : index
    %c0_82 = arith.constant 0 : index
    %78 = vector.load %arg6[%c32_81, %c0_82] : memref<128x128xf32, #tpu.memory_space<vmem>>, vector<1x128xf32>
    tpu.vector_store %arg6[%c32_81, %c0_82], %77 {strides = array<i32>} : memref<128x128xf32, #tpu.memory_space<vmem>>, vector<1x128xf32>,
    %c32_83 = arith.constant 32 : index
    %c31_84 = arith.constant 31 : index
    %79 = vector.load %arg5[%c32_83, %c31_84] : memref<63x192xf32, #tpu.memory_space<vmem>>, vector<1x128xf32>
    %c33_85 = arith.constant 33 : index
    %c0_86 = arith.constant 0 : index
    %80 = vector.load %arg6[%c33_85, %c0_86] : memref<128x128xf32, #tpu.memory_space<vmem>>, vector<1x128xf32>
    tpu.vector_store %arg6[%c33_85, %c0_86], %79 {strides = array<i32>} : memref<128x128xf32, #tpu.memory_space<vmem>>, vector<1x128xf32>,
    %c33_87 = arith.constant 33 : index
    %c30_88 = arith.constant 30 : index
    %81 = vector.load %arg5[%c33_87, %c30_88] : memref<63x192xf32, #tpu.memory_space<vmem>>, vector<1x128xf32>
    %c34_89 = arith.constant 34 : index
    %c0_90 = arith.constant 0 : index
    %82 = vector.load %arg6[%c34_89, %c0_90] : memref<128x128xf32, #tpu.memory_space<vmem>>, vector<1x128xf32>
    tpu.vector_store %arg6[%c34_89, %c0_90], %81 {strides = array<i32>} : memref<128x128xf32, #tpu.memory_space<vmem>>, vector<1x128xf32>,
    %c34_91 = arith.constant 34 : index
    %c29_92 = arith.constant 29 : index
    %83 = vector.load %arg5[%c34_91, %c29_92] : memref<63x192xf32, #tpu.memory_space<vmem>>, vector<1x128xf32>
    %c35_93 = arith.constant 35 : index
    %c0_94 = arith.constant 0 : index
    %84 = vector.load %arg6[%c35_93, %c0_94] : memref<128x128xf32, #tpu.memory_space<vmem>>, vector<1x128xf32>
    tpu.vector_store %arg6[%c35_93, %c0_94], %83 {strides = array<i32>} : memref<128x128xf32, #tpu.memory_space<vmem>>, vector<1x128xf32>,
    %c35_95 = arith.constant 35 : index
    %c28_96 = arith.constant 28 : index
    %85 = vector.load %arg5[%c35_95, %c28_96] : memref<63x192xf32, #tpu.memory_space<vmem>>, vector<1x128xf32>
    %c36_97 = arith.constant 36 : index
    %c0_98 = arith.constant 0 : index
    %86 = vector.load %arg6[%c36_97, %c0_98] : memref<128x128xf32, #tpu.memory_space<vmem>>, vector<1x128xf32>
    tpu.vector_store %arg6[%c36_97, %c0_98], %85 {strides = array<i32>} : memref<128x128xf32, #tpu.memory_space<vmem>>, vector<1x128xf32>,
    %c36_99 = arith.constant 36 : index
    %c27_100 = arith.constant 27 : index
    %87 = vector.load %arg5[%c36_99, %c27_100] : memref<63x192xf32, #tpu.memory_space<vmem>>, vector<1x128xf32>
    %c37_101 = arith.constant 37 : index
    %c0_102 = arith.constant 0 : index
    %88 = vector.load %arg6[%c37_101, %c0_102] : memref<128x128xf32, #tpu.memory_space<vmem>>, vector<1x128xf32>
    tpu.vector_store %arg6[%c37_101, %c0_102], %87 {strides = array<i32>} : memref<128x128xf32, #tpu.memory_space<vmem>>, vector<1x128xf32>,
    %c37_103 = arith.constant 37 : index
    %c26_104 = arith.constant 26 : index
    %89 = vector.load %arg5[%c37_103, %c26_104] : memref<63x192xf32, #tpu.memory_space<vmem>>, vector<1x128xf32>
    %c38_105 = arith.constant 38 : index
    %c0_106 = arith.constant 0 : index
    %90 = vector.load %arg6[%c38_105, %c0_106] : memref<128x128xf32, #tpu.memory_space<vmem>>, vector<1x128xf32>
    tpu.vector_store %arg6[%c38_105, %c0_106], %89 {strides = array<i32>} : memref<128x128xf32, #tpu.memory_space<vmem>>, vector<1x128xf32>,
    %c38_107 = arith.constant 38 : index
    %c25_108 = arith.constant 25 : index
    %91 = vector.load %arg5[%c38_107, %c25_108] : memref<63x192xf32, #tpu.memory_space<vmem>>, vector<1x128xf32>
    %c39_109 = arith.constant 39 : index
    %c0_110 = arith.constant 0 : index
    %92 = vector.load %arg6[%c39_109, %c0_110] : memref<128x128xf32, #tpu.memory_space<vmem>>, vector<1x128xf32>
    tpu.vector_store %arg6[%c39_109, %c0_110], %91 {strides = array<i32>} : memref<128x128xf32, #tpu.memory_space<vmem>>, vector<1x128xf32>,
    %c39_111 = arith.constant 39 : index
    %c24_112 = arith.constant 24 : index
    %93 = vector.load %arg5[%c39_111, %c24_112] : memref<63x192xf32, #tpu.memory_space<vmem>>, vector<1x128xf32>
    %c40_113 = arith.constant 40 : index
    %c0_114 = arith.constant 0 : index
    %94 = vector.load %arg6[%c40_113, %c0_114] : memref<128x128xf32, #tpu.memory_space<vmem>>, vector<1x128xf32>
    tpu.vector_store %arg6[%c40_113, %c0_114], %93 {strides = array<i32>} : memref<128x128xf32, #tpu.memory_space<vmem>>, vector<1x128xf32>,
    %c40_115 = arith.constant 40 : index
    %c23_116 = arith.constant 23 : index
    %95 = vector.load %arg5[%c40_115, %c23_116] : memref<63x192xf32, #tpu.memory_space<vmem>>, vector<1x128xf32>
    %c41_117 = arith.constant 41 : index
    %c0_118 = arith.constant 0 : index
    %96 = vector.load %arg6[%c41_117, %c0_118] : memref<128x128xf32, #tpu.memory_space<vmem>>, vector<1x128xf32>
    tpu.vector_store %arg6[%c41_117, %c0_118], %95 {strides = array<i32>} : memref<128x128xf32, #tpu.memory_space<vmem>>, vector<1x128xf32>,
    %c41_119 = arith.constant 41 : index
    %c22_120 = arith.constant 22 : index
    %97 = vector.load %arg5[%c41_119, %c22_120] : memref<63x192xf32, #tpu.memory_space<vmem>>, vector<1x128xf32>
    %c42_121 = arith.constant 42 : index
    %c0_122 = arith.constant 0 : index
    %98 = vector.load %arg6[%c42_121, %c0_122] : memref<128x128xf32, #tpu.memory_space<vmem>>, vector<1x128xf32>
    tpu.vector_store %arg6[%c42_121, %c0_122], %97 {strides = array<i32>} : memref<128x128xf32, #tpu.memory_space<vmem>>, vector<1x128xf32>,
    %c42_123 = arith.constant 42 : index
    %c21_124 = arith.constant 21 : index
    %99 = vector.load %arg5[%c42_123, %c21_124] : memref<63x192xf32, #tpu.memory_space<vmem>>, vector<1x128xf32>
    %c43_125 = arith.constant 43 : index
    %c0_126 = arith.constant 0 : index
    %100 = vector.load %arg6[%c43_125, %c0_126] : memref<128x128xf32, #tpu.memory_space<vmem>>, vector<1x128xf32>
    tpu.vector_store %arg6[%c43_125, %c0_126], %99 {strides = array<i32>} : memref<128x128xf32, #tpu.memory_space<vmem>>, vector<1x128xf32>,
    %c43_127 = arith.constant 43 : index
    %c20_128 = arith.constant 20 : index
    %101 = vector.load %arg5[%c43_127, %c20_128] : memref<63x192xf32, #tpu.memory_space<vmem>>, vector<1x128xf32>
    %c44_129 = arith.constant 44 : index
    %c0_130 = arith.constant 0 : index
    %102 = vector.load %arg6[%c44_129, %c0_130] : memref<128x128xf32, #tpu.memory_space<vmem>>, vector<1x128xf32>
    tpu.vector_store %arg6[%c44_129, %c0_130], %101 {strides = array<i32>} : memref<128x128xf32, #tpu.memory_space<vmem>>, vector<1x128xf32>,
    %c44_131 = arith.constant 44 : index
    %c19_132 = arith.constant 19 : index
    %103 = vector.load %arg5[%c44_131, %c19_132] : memref<63x192xf32, #tpu.memory_space<vmem>>, vector<1x128xf32>
    %c45_133 = arith.constant 45 : index
    %c0_134 = arith.constant 0 : index
    %104 = vector.load %arg6[%c45_133, %c0_134] : memref<128x128xf32, #tpu.memory_space<vmem>>, vector<1x128xf32>
    tpu.vector_store %arg6[%c45_133, %c0_134], %103 {strides = array<i32>} : memref<128x128xf32, #tpu.memory_space<vmem>>, vector<1x128xf32>,
    %c45_135 = arith.constant 45 : index
    %c18_136 = arith.constant 18 : index
    %105 = vector.load %arg5[%c45_135, %c18_136] : memref<63x192xf32, #tpu.memory_space<vmem>>, vector<1x128xf32>
    %c46_137 = arith.constant 46 : index
    %c0_138 = arith.constant 0 : index
    %106 = vector.load %arg6[%c46_137, %c0_138] : memref<128x128xf32, #tpu.memory_space<vmem>>, vector<1x128xf32>
    tpu.vector_store %arg6[%c46_137, %c0_138], %105 {strides = array<i32>} : memref<128x128xf32, #tpu.memory_space<vmem>>, vector<1x128xf32>,
    %c46_139 = arith.constant 46 : index
    %c17_140 = arith.constant 17 : index
    %107 = vector.load %arg5[%c46_139, %c17_140] : memref<63x192xf32, #tpu.memory_space<vmem>>, vector<1x128xf32>
    %c47_141 = arith.constant 47 : index
    %c0_142 = arith.constant 0 : index
    %108 = vector.load %arg6[%c47_141, %c0_142] : memref<128x128xf32, #tpu.memory_space<vmem>>, vector<1x128xf32>
    tpu.vector_store %arg6[%c47_141, %c0_142], %107 {strides = array<i32>} : memref<128x128xf32, #tpu.memory_space<vmem>>, vector<1x128xf32>,
    %c47_143 = arith.constant 47 : index
    %c16_144 = arith.constant 16 : index
    %109 = vector.load %arg5[%c47_143, %c16_144] : memref<63x192xf32, #tpu.memory_space<vmem>>, vector<1x128xf32>
    %c48_145 = arith.constant 48 : index
    %c0_146 = arith.constant 0 : index
    %110 = vector.load %arg6[%c48_145, %c0_146] : memref<128x128xf32, #tpu.memory_space<vmem>>, vector<1x128xf32>
    tpu.vector_store %arg6[%c48_145, %c0_146], %109 {strides = array<i32>} : memref<128x128xf32, #tpu.memory_space<vmem>>, vector<1x128xf32>,
    %c48_147 = arith.constant 48 : index
    %c15_148 = arith.constant 15 : index
    %111 = vector.load %arg5[%c48_147, %c15_148] : memref<63x192xf32, #tpu.memory_space<vmem>>, vector<1x128xf32>
    %c49_149 = arith.constant 49 : index
    %c0_150 = arith.constant 0 : index
    %112 = vector.load %arg6[%c49_149, %c0_150] : memref<128x128xf32, #tpu.memory_space<vmem>>, vector<1x128xf32>
    tpu.vector_store %arg6[%c49_149, %c0_150], %111 {strides = array<i32>} : memref<128x128xf32, #tpu.memory_space<vmem>>, vector<1x128xf32>,
    %c49_151 = arith.constant 49 : index
    %c14_152 = arith.constant 14 : index
    %113 = vector.load %arg5[%c49_151, %c14_152] : memref<63x192xf32, #tpu.memory_space<vmem>>, vector<1x128xf32>
    %c50_153 = arith.constant 50 : index
    %c0_154 = arith.constant 0 : index
    %114 = vector.load %arg6[%c50_153, %c0_154] : memref<128x128xf32, #tpu.memory_space<vmem>>, vector<1x128xf32>
    tpu.vector_store %arg6[%c50_153, %c0_154], %113 {strides = array<i32>} : memref<128x128xf32, #tpu.memory_space<vmem>>, vector<1x128xf32>,
    %c50_155 = arith.constant 50 : index
    %c13_156 = arith.constant 13 : index
    %115 = vector.load %arg5[%c50_155, %c13_156] : memref<63x192xf32, #tpu.memory_space<vmem>>, vector<1x128xf32>
    %c51_157 = arith.constant 51 : index
    %c0_158 = arith.constant 0 : index
    %116 = vector.load %arg6[%c51_157, %c0_158] : memref<128x128xf32, #tpu.memory_space<vmem>>, vector<1x128xf32>
    tpu.vector_store %arg6[%c51_157, %c0_158], %115 {strides = array<i32>} : memref<128x128xf32, #tpu.memory_space<vmem>>, vector<1x128xf32>,
    %c51_159 = arith.constant 51 : index
    %c12_160 = arith.constant 12 : index
    %117 = vector.load %arg5[%c51_159, %c12_160] : memref<63x192xf32, #tpu.memory_space<vmem>>, vector<1x128xf32>
    %c52_161 = arith.constant 52 : index
    %c0_162 = arith.constant 0 : index
    %118 = vector.load %arg6[%c52_161, %c0_162] : memref<128x128xf32, #tpu.memory_space<vmem>>, vector<1x128xf32>
    tpu.vector_store %arg6[%c52_161, %c0_162], %117 {strides = array<i32>} : memref<128x128xf32, #tpu.memory_space<vmem>>, vector<1x128xf32>,
    %c52_163 = arith.constant 52 : index
    %c11_164 = arith.constant 11 : index
    %119 = vector.load %arg5[%c52_163, %c11_164] : memref<63x192xf32, #tpu.memory_space<vmem>>, vector<1x128xf32>
    %c53_165 = arith.constant 53 : index
    %c0_166 = arith.constant 0 : index
    %120 = vector.load %arg6[%c53_165, %c0_166] : memref<128x128xf32, #tpu.memory_space<vmem>>, vector<1x128xf32>
    tpu.vector_store %arg6[%c53_165, %c0_166], %119 {strides = array<i32>} : memref<128x128xf32, #tpu.memory_space<vmem>>, vector<1x128xf32>,
    %c53_167 = arith.constant 53 : index
    %c10_168 = arith.constant 10 : index
    %121 = vector.load %arg5[%c53_167, %c10_168] : memref<63x192xf32, #tpu.memory_space<vmem>>, vector<1x128xf32>
    %c54_169 = arith.constant 54 : index
    %c0_170 = arith.constant 0 : index
    %122 = vector.load %arg6[%c54_169, %c0_170] : memref<128x128xf32, #tpu.memory_space<vmem>>, vector<1x128xf32>
    tpu.vector_store %arg6[%c54_169, %c0_170], %121 {strides = array<i32>} : memref<128x128xf32, #tpu.memory_space<vmem>>, vector<1x128xf32>,
    %c54_171 = arith.constant 54 : index
    %c9_172 = arith.constant 9 : index
    %123 = vector.load %arg5[%c54_171, %c9_172] : memref<63x192xf32, #tpu.memory_space<vmem>>, vector<1x128xf32>
    %c55_173 = arith.constant 55 : index
    %c0_174 = arith.constant 0 : index
    %124 = vector.load %arg6[%c55_173, %c0_174] : memref<128x128xf32, #tpu.memory_space<vmem>>, vector<1x128xf32>
    tpu.vector_store %arg6[%c55_173, %c0_174], %123 {strides = array<i32>} : memref<128x128xf32, #tpu.memory_space<vmem>>, vector<1x128xf32>,
    %c55_175 = arith.constant 55 : index
    %c8_176 = arith.constant 8 : index
    %125 = vector.load %arg5[%c55_175, %c8_176] : memref<63x192xf32, #tpu.memory_space<vmem>>, vector<1x128xf32>
    %c56_177 = arith.constant 56 : index
    %c0_178 = arith.constant 0 : index
    %126 = vector.load %arg6[%c56_177, %c0_178] : memref<128x128xf32, #tpu.memory_space<vmem>>, vector<1x128xf32>
    tpu.vector_store %arg6[%c56_177, %c0_178], %125 {strides = array<i32>} : memref<128x128xf32, #tpu.memory_space<vmem>>, vector<1x128xf32>,
    %c56_179 = arith.constant 56 : index
    %c7_180 = arith.constant 7 : index
    %127 = vector.load %arg5[%c56_179, %c7_180] : memref<63x192xf32, #tpu.memory_space<vmem>>, vector<1x128xf32>
    %c57_181 = arith.constant 57 : index
    %c0_182 = arith.constant 0 : index
    %128 = vector.load %arg6[%c57_181, %c0_182] : memref<128x128xf32, #tpu.memory_space<vmem>>, vector<1x128xf32>
    tpu.vector_store %arg6[%c57_181, %c0_182], %127 {strides = array<i32>} : memref<128x128xf32, #tpu.memory_space<vmem>>, vector<1x128xf32>,
    %c57_183 = arith.constant 57 : index
    %c6_184 = arith.constant 6 : index
    %129 = vector.load %arg5[%c57_183, %c6_184] : memref<63x192xf32, #tpu.memory_space<vmem>>, vector<1x128xf32>
    %c58_185 = arith.constant 58 : index
    %c0_186 = arith.constant 0 : index
    %130 = vector.load %arg6[%c58_185, %c0_186] : memref<128x128xf32, #tpu.memory_space<vmem>>, vector<1x128xf32>
    tpu.vector_store %arg6[%c58_185, %c0_186], %129 {strides = array<i32>} : memref<128x128xf32, #tpu.memory_space<vmem>>, vector<1x128xf32>,
    %c58_187 = arith.constant 58 : index
    %c5_188 = arith.constant 5 : index
    %131 = vector.load %arg5[%c58_187, %c5_188] : memref<63x192xf32, #tpu.memory_space<vmem>>, vector<1x128xf32>
    %c59_189 = arith.constant 59 : index
    %c0_190 = arith.constant 0 : index
    %132 = vector.load %arg6[%c59_189, %c0_190] : memref<128x128xf32, #tpu.memory_space<vmem>>, vector<1x128xf32>
    tpu.vector_store %arg6[%c59_189, %c0_190], %131 {strides = array<i32>} : memref<128x128xf32, #tpu.memory_space<vmem>>, vector<1x128xf32>,
    %c59_191 = arith.constant 59 : index
    %c4_192 = arith.constant 4 : index
    %133 = vector.load %arg5[%c59_191, %c4_192] : memref<63x192xf32, #tpu.memory_space<vmem>>, vector<1x128xf32>
    %c60_193 = arith.constant 60 : index
    %c0_194 = arith.constant 0 : index
    %134 = vector.load %arg6[%c60_193, %c0_194] : memref<128x128xf32, #tpu.memory_space<vmem>>, vector<1x128xf32>
    tpu.vector_store %arg6[%c60_193, %c0_194], %133 {strides = array<i32>} : memref<128x128xf32, #tpu.memory_space<vmem>>, vector<1x128xf32>,
    %c60_195 = arith.constant 60 : index
    %c3_196 = arith.constant 3 : index
    %135 = vector.load %arg5[%c60_195, %c3_196] : memref<63x192xf32, #tpu.memory_space<vmem>>, vector<1x128xf32>
    %c61_197 = arith.constant 61 : index
    %c0_198 = arith.constant 0 : index
    %136 = vector.load %arg6[%c61_197, %c0_198] : memref<128x128xf32, #tpu.memory_space<vmem>>, vector<1x128xf32>
    tpu.vector_store %arg6[%c61_197, %c0_198], %135 {strides = array<i32>} : memref<128x128xf32, #tpu.memory_space<vmem>>, vector<1x128xf32>,
    %c61_199 = arith.constant 61 : index
    %c2_200 = arith.constant 2 : index
    %137 = vector.load %arg5[%c61_199, %c2_200] : memref<63x192xf32, #tpu.memory_space<vmem>>, vector<1x128xf32>
    %c62_201 = arith.constant 62 : index
    %c0_202 = arith.constant 0 : index
    %138 = vector.load %arg6[%c62_201, %c0_202] : memref<128x128xf32, #tpu.memory_space<vmem>>, vector<1x128xf32>
    tpu.vector_store %arg6[%c62_201, %c0_202], %137 {strides = array<i32>} : memref<128x128xf32, #tpu.memory_space<vmem>>, vector<1x128xf32>,
    %c62_203 = arith.constant 62 : index
    %c1_204 = arith.constant 1 : index
    %139 = vector.load %arg5[%c62_203, %c1_204] : memref<63x192xf32, #tpu.memory_space<vmem>>, vector<1x128xf32>
    %c63_205 = arith.constant 63 : index
    %c0_206 = arith.constant 0 : index
    %140 = vector.load %arg6[%c63_205, %c0_206] : memref<128x128xf32, #tpu.memory_space<vmem>>, vector<1x128xf32>
    tpu.vector_store %arg6[%c63_205, %c0_206], %139 {strides = array<i32>} : memref<128x128xf32, #tpu.memory_space<vmem>>, vector<1x128xf32>,
    %cst_207 = arith.constant 0.000000e+00 : f32
    %141 = vector.broadcast %cst_207 : f32 to vector<64x128xf32>
    %c64_208 = arith.constant 64 : index
    %c0_209 = arith.constant 0 : index
    %142 = vector.load %arg6[%c64_208, %c0_209] : memref<128x128xf32, #tpu.memory_space<vmem>>, vector<64x128xf32>
    tpu.vector_store %arg6[%c64_208, %c0_209], %141 {strides = array<i32>} : memref<128x128xf32, #tpu.memory_space<vmem>>, vector<64x128xf32>,
    %c0_210 = arith.constant 0 : index
    %c0_211 = arith.constant 0 : index
    %143 = vector.load %arg1[%c0_210, %c0_211] : memref<63x128xf32, #tpu.memory_space<vmem>>, vector<63x128xf32>
    %c0_212 = arith.constant 0 : index
    %c0_213 = arith.constant 0 : index
    %144 = vector.load %arg6[%c0_212, %c0_213] : memref<128x128xf32, #tpu.memory_space<vmem>>, vector<128x128xf32>
    %cst_214 = arith.constant dense<0.000000e+00> : vector<63x128xf32>
    %145 = tpu.matmul %143, %144, %cst_214 {dimension_numbers = #tpu.dot_dimension_numbers<[1], [1], [0], [0], [0, 0, 1, 0], [], []>} : vector<63x128xf32>, vector<128x128xf32>, vector<63x128xf32> -> vector<63x128xf32>
    %c0_215 = arith.constant 0 : index
    %c0_216 = arith.constant 0 : index
    %146 = vector.load %arg4[%c0_215, %c0_216] : memref<63x128xf32, #tpu.memory_space<vmem>>, vector<63x128xf32>
    tpu.vector_store %arg4[%c0_215, %c0_216], %145 {strides = array<i32>} : memref<63x128xf32, #tpu.memory_space<vmem>>, vector<63x128xf32>,
    return
  }
}

</mosaic_0001>

<bundles_post_ra>
// kernel: gac_forward.1
= control target key start
LH: loop header
LB: loop body
LE: loop exit
PB: predicated region body
PF: predicated region fallthrough
CT: control target
= control target key end

     0   :  { %vm70_vm0 = vcmask 261120   ;;  %vm156_vm1 = vcmask 523264   ;;  %v1394_v3 = vmov 0.0   ;;  %vm164_vm2 = vcmask 522240   ;;  %s1873_s0 = inlined_call_operand.vmem [shape: bf16[63,32], index: 0, kind: input, shape index: {}]   ;;  %s1874_s1 = inlined_call_operand.vmem [shape: f32[63,128], index: 1, kind: input, shape index: {}]   ;;  %s1875_s2 = inlined_call_operand.vmem [shape: bf16[32,64], index: 2, kind: input, shape index: {}]   ;;  %s1876_s3 = inlined_call_operand.vmem [shape: f32[1,64], index: 3, kind: input, shape index: {}]   ;;  %s1877_s4 = inlined_call_operand.hbm [shape: f32[63,128], index: 4, kind: output, shape index: {}]  }
   0x1   :  { %v1366_v0 = vld [vmem:[%s1875_s2 + $0x8] sm:$0xff]   ;;  %v1367_v1 = vld [vmem:[%s1875_s2] sm:$0xff]   ;;  %180 = vst.msk [vmem:[#allocation2 + $0x68] sm:$0xff] %vm156_vm1, %v1394_v3  ;;  %168 = vst.msk [vmem:[#allocation2 + $0x8] sm:$0xff] %vm156_vm1, %v1394_v3  ;;  %1266 = vmatprep.subr.mxu1 %v1394_v3 }
   0x2   :  { %1210 = vmatprep.subr.bf16.mxu0 %v1366_v0  ;;  %v1368_v2 = vld [vmem:[%s1873_s0] sm:$0xff]   ;;  %170 = vst.msk [vmem:[#allocation2 + $0x18] sm:$0xff] %vm156_vm1, %v1394_v3  ;;  %172 = vst.msk [vmem:[#allocation2 + $0x28] sm:$0xff] %vm156_vm1, %v1394_v3  ;;  %1282 = vmatpush3.xpose.msra.mxu1 %v1394_v3  ;;  %v1369_v4 = vld [vmem:[%s1873_s0 + $0x8] sm:$0xff]  }
   0x3   :  { %1211 = vmatpush3.bf16.msra.mxu0 %v1366_v0  ;;  %174 = vst.msk [vmem:[#allocation2 + $0x38] sm:$0xff] %vm156_vm1, %v1394_v3  ;;  %176 = vst.msk [vmem:[#allocation2 + $0x48] sm:$0xff] %vm156_vm1, %v1394_v3  ;;  %1214 = vmatprep.mubr.msk.bf16.mxu0 %vm70_vm0, %v1368_v2 }
   0x4   :  { %178 = vst.msk [vmem:[#allocation2 + $0x58] sm:$0xff] %vm156_vm1, %v1394_v3  ;;  %1212 = vmatprep.subr.bf16.mxu0 %v1367_v1  ;;  %1267 = vmatprep.subr.mxu1 %v1394_v3 }
   0x5   :  { %183 = vst.msk [vmem:[#allocation2 + $0x78] sm:$0x7f] %vm164_vm2, %v1394_v3 }
   0x6   :  { %9 = vsyncpa [#allocation5], 0  ;;  %v1370_v5 = vld [vmem:[%s1873_s0 + $0x10] sm:$0xff]   ;;  %1283 = vmatpush3.xpose.msra.mxu1 %v1394_v3  ;;  %s1901_s24 = smov 120   ;;  %v1371_v8 = vld [vmem:[%s1873_s0 + $0x18] sm:$0xff]   ;;  %s1396_s27 = smov 121  }
   0x7   :  { %1213 = vmatpush3.bf16.msra.mxu0 %v1367_v1  ;;  %1268 = vmatprep.subr.mxu1 %v1394_v3  ;;  %s1906_s28 = smov 122   ;;  %s1905_s0 = smov 123   ;;  %vm166_vm3 = vcmask 1048064   ;;  %vm181_vm4 = vcmask 1047040   ;;  %vm200_vm5 = vcmask 1046528   ;;  %vm240_vm6 = vcmask 1039872  }
   0x8   :  { %1222 = vmatprep.subr.mxu0 %v1394_v3  ;;  %v913_v6 = vld [vmem:[#allocation2 + $0x6f] ss:$0 sm:$0xff]  ;;  %s1904_s29 = smov 124   ;;  %s1903_s30 = smov 125   ;;  %v829_v16 = vld [vmem:[#allocation2 + $0x68] ss:$0 sm:$0xff] }
   0x9   :  { %918 = vrot.lane.b32.xlu1 %v913_v6, %s1901_s24  ;;  %s1902_s5 = smov 126   ;;  %s1402_s6 = smov 127   ;;  %v841_v17 = vld [vmem:[#allocation2 + $0x69] ss:$0 sm:$0xff]  ;;  %v853_v18 = vld [vmem:[#allocation2 + $0x6a] ss:$0 sm:$0xff] }
   0xa   :  { %1215 = vmatmul.mubr.msk.bf16.vlgmr.msra.gmra.mxu0 %vm70_vm0, %v1369_v4  ;;  %1284 = vmatpush3.xpose.msra.mxu1 %v1394_v3  ;;  %s1893_s7 = smov 112   ;;  %s1900_s8 = smov 113   ;;  %v865_v19 = vld [vmem:[#allocation2 + $0x6b] ss:$0 sm:$0xff]  ;;  %v877_v20 = vld [vmem:[#allocation2 + $0x6c] ss:$0 sm:$0xff] }
   0xb   :  { %1218 = vmatprep.mubr.msk.bf16.mxu0 %vm70_vm0, %v1370_v5  ;;  %1223 = vmatpush3.xpose.msra.mxu0 %v1394_v3  ;;  %v817_v15 = vld [vmem:[#allocation2 + $0x5f] ss:$0 sm:$0xff]  ;;  %s1899_s9 = smov 114   ;;  %s1898_s10 = smov 115   ;;  %v889_v21 = vld [vmem:[#allocation2 + $0x6d] ss:$0 sm:$0xff] }
   0xc   :  { %v925_v7 = vld [vmem:[#allocation2 + $0x78] ss:$0 sm:$0xff]  ;;  %1224 = vmatprep.subr.mxu0 %v1394_v3  ;;  %1269 = vmatprep.subr.mxu1 %v1394_v3  ;;  %v937_v9 = vld [vmem:[#allocation2 + $0x79] ss:$0 sm:$0xff]  ;;  %v949_v10 = vld [vmem:[#allocation2 + $0x7a] ss:$0 sm:$0xff] }
   0xd   :  { %930 = vrot.lane.b32.xlu1 %v925_v7, %s1396_s27  ;;  %v961_v11 = vld [vmem:[#allocation2 + $0x7b] ss:$0 sm:$0xff]  ;;  %v973_v12 = vld [vmem:[#allocation2 + $0x7c] ss:$0 sm:$0xff]  ;;  %v985_v13 = vld [vmem:[#allocation2 + $0x7d] ss:$0 sm:$0xff] }
   0xe   :  { %1285 = vmatpush3.xpose.msra.mxu1 %v1394_v3  ;;  %v997_v14 = vld [vmem:[#allocation2 + $0x7e] ss:$0 sm:$0xff]  ;;  %s1897_s11 = smov 116   ;;  %s1896_s12 = smov 117   ;;  %v901_v22 = vld [vmem:[#allocation2 + $0x6e] ss:$0 sm:$0xff] }
   0xf   :  { %1225 = vmatpush3.xpose.msra.mxu0 %v1394_v3  ;;  %1270 = vmatprep.subr.mxu1 %v1394_v3  ;;  %s1895_s13 = smov 118   ;;  %s1894_s14 = smov 119   ;;  %v721_v23 = vld [vmem:[#allocation2 + $0x4f] ss:$0 sm:$0xff]  ;;  %v733_v24 = vld [vmem:[#allocation2 + $0x58] ss:$0 sm:$0xff] }
  0x10   :  { %1226 = vmatprep.subr.mxu0 %v1394_v3  ;;  %s1892_s15 = smov 104   ;;  %s1891_s16 = smov 105   ;;  %v745_v25 = vld [vmem:[#allocation2 + $0x59] ss:$0 sm:$0xff]  ;;  %v757_v26 = vld [vmem:[#allocation2 + $0x5a] ss:$0 sm:$0xff] }
  0x11   :  { %942 = vrot.lane.b32.xlu1 %v937_v9, %s1906_s28  ;;  %s1890_s17 = smov 106   ;;  %s1889_s18 = smov 107   ;;  %v769_v27 = vld [vmem:[#allocation2 + $0x5b] ss:$0 sm:$0xff]  ;;  %v781_v28 = vld [vmem:[#allocation2 + $0x5c] ss:$0 sm:$0xff] }
  0x12   :  { %1219 = vmatmul.mubr.msk.bf16.gmra.mxu0 %vm70_vm0, %v1371_v8  ;;  %1286 = vmatpush3.xpose.msra.mxu1 %v1394_v3  ;;  %s1888_s19 = smov 108   ;;  %s1887_s20 = smov 109   ;;  %v793_v29 = vld [vmem:[#allocation2 + $0x5d] ss:$0 sm:$0xff]  ;;  %v805_v30 = vld [vmem:[#allocation2 + $0x5e] ss:$0 sm:$0xff] }
  0x13   :  { %1227 = vmatpush3.xpose.msra.mxu0 %v1394_v3  ;;  %1271 = vmatprep.subr.mxu1 %v1394_v3  ;;  %s1878_s2 = smov 110   ;;  %s1879_s21 = smov 111   ;;  %v625_v31 = vld [vmem:[#allocation2 + $0x3f] ss:$0 sm:$0xff]  ;;  %v637_v32 = vld [vmem:[#allocation2 + $0x48] ss:$0 sm:$0xff] }
  0x14   :  { %1228 = vmatprep.subr.mxu0 %v1394_v3  ;;  %s1419_s22 = smov 96   ;;  %s1880_s23 = smov 97   ;;  %v649_v33 = vld [vmem:[#allocation2 + $0x49] ss:$0 sm:$0xff]  ;;  %v661_v34 = vld [vmem:[#allocation2 + $0x4a] ss:$0 sm:$0xff] }
  0x15   :  { %954 = vrot.lane.b32.xlu1 %v949_v10, %s1905_s0  ;;  %s1886_s25 = smov 98   ;;  %s1881_s26 = smov 99   ;;  %v673_v35 = vld [vmem:[#allocation2 + $0x4b] ss:$0 sm:$0xff]  ;;  %v685_v36 = vld [vmem:[#allocation2 + $0x4c] ss:$0 sm:$0xff] }
  0x16   :  { %1287 = vmatpush3.xpose.msra.mxu1 %v1394_v3  ;;  %v697_v38 = vld [vmem:[#allocation2 + $0x4d] ss:$0 sm:$0xff]  ;;  %v709_v40 = vld [vmem:[#allocation2 + $0x4e] ss:$0 sm:$0xff]  ;;  %v529_v42 = vld [vmem:[#allocation2 + $0x2f] ss:$0 sm:$0xff] }
  0x17   :  { %1229 = vmatpush3.xpose.msra.mxu0 %v1394_v3  ;;  %1272 = vmatprep.subr.mxu1 %v1394_v3  ;;  %v541_v44 = vld [vmem:[#allocation2 + $0x38] ss:$0 sm:$0xff]  ;;  %v553_v46 = vld [vmem:[#allocation2 + $0x39] ss:$0 sm:$0xff]  ;;  %v565_v48 = vld [vmem:[#allocation2 + $0x3a] ss:$0 sm:$0xff] }
  0x18   :  { %1230 = vmatprep.subr.mxu0 %v1394_v3  ;;  %v577_v50 = vld [vmem:[#allocation2 + $0x3b] ss:$0 sm:$0xff]  ;;  %v589_v52 = vld [vmem:[#allocation2 + $0x3c] ss:$0 sm:$0xff]  ;;  %v601_v54 = vld [vmem:[#allocation2 + $0x3d] ss:$0 sm:$0xff] }
  0x19   :  { %966 = vrot.lane.b32.xlu1 %v961_v11, %s1904_s29  ;;  %v613_v56 = vld [vmem:[#allocation2 + $0x3e] ss:$0 sm:$0xff]  ;;  %v433_v58 = vld [vmem:[#allocation2 + $0x1f] ss:$0 sm:$0xff]  ;;  %v1169_v4 = vld [vmem:[%s1876_s3] ss:$0 sm:$0xff] }
  0x1a   :  { %1288 = vmatpush3.xpose.msra.mxu1 %v1394_v3  ;;  %s1436_s3 = smov 64   ;;  %s1449_s24 = smov 77   ;;  %vm1004_vm7 = vcmask 1039360   ;;  %vm248_vm8 = vcmask 1037824   ;;  %vm536_vm9 = vcmask 719872   ;;  %vm452_vm10 = vcmask 662528  }
  0x1b   :  { %1231 = vmatpush3.xpose.msra.mxu0 %v1394_v3  ;;  %1273 = vmatprep.subr.mxu1 %v1394_v3  ;;  %s1452_s29 = smov 65   ;;  %s1453_s0 = smov 66   ;;  %vm464_vm11 = vcmask 670720   ;;  %vm476_vm12 = vcmask 678912   ;;  %vm488_vm13 = vcmask 687104   ;;  %vm500_vm14 = vcmask 695296  }
  0x1c   :  { %1232 = vmatprep.subr.mxu0 %v1394_v3  ;;  %s1454_s28 = smov 67   ;;  %vm512_vm15 = vcmask 703488   ;;  %vm524_vm0 = vcmask 711680  }
  0x1d   :  { %978 = vrot.lane.b32.xlu1 %v973_v12, %s1903_s30  ;;  %s1451_s30 = smov 79  }
  0x1e   :  { %1289 = vmatpush3.xpose.msra.mxu1 %v1394_v3 }
  0x1f   :  { %1233 = vmatpush3.xpose.msra.mxu0 %v1394_v3 }
  0x20   :  { %1234 = vmatprep.subr.mxu0 %v1394_v3 }
  0x21   :  { %990 = vrot.lane.b32.xlu1 %v985_v13, %s1902_s5  ;;  %s1450_s5 = smov 78  }
  0x23   :  { %1235 = vmatpush3.xpose.msra.mxu0 %v1394_v3 }
  0x24   :  { %1236 = vmatprep.subr.mxu0 %v1394_v3 }
  0x25   :  { %1002 = vrot.lane.b32.xlu1 %v997_v14, %s1402_s6 }
  0x27   :  { %1237 = vmatpush3.xpose.msra.mxu0 %v1394_v3 }
  0x29   :  { %822 = vrot.lane.b32.xlu1 %v817_v15, %s1893_s7  ;;  %s1440_s7 = smov 84  }
  0x2d   :  { %834 = vrot.lane.b32.xlu1 %v829_v16, %s1900_s8  ;;  %s1448_s8 = smov 76  }
  0x31   :  { %846 = vrot.lane.b32.xlu1 %v841_v17, %s1899_s9  ;;  %s1447_s9 = smov 75  }
  0x35   :  { %858 = vrot.lane.b32.xlu1 %v853_v18, %s1898_s10  ;;  %s1446_s10 = smov 74  }
  0x39   :  { %870 = vrot.lane.b32.xlu1 %v865_v19, %s1897_s11  ;;  %s1445_s11 = smov 73  }
  0x3d   :  { %882 = vrot.lane.b32.xlu1 %v877_v20, %s1896_s12  ;;  %s1444_s12 = smov 72  }
  0x41   :  { %894 = vrot.lane.b32.xlu1 %v889_v21, %s1895_s13  ;;  %s1443_s13 = smov 87  }
  0x45   :  { %906 = vrot.lane.b32.xlu1 %v901_v22, %s1894_s14  ;;  %s1442_s14 = smov 86  }
  0x49   :  { %726 = vrot.lane.b32.xlu1 %v721_v23, %s1892_s15  ;;  %s1438_s15 = smov 82  }
  0x4d   :  { %738 = vrot.lane.b32.xlu1 %v733_v24, %s1891_s16  ;;  %s1439_s16 = smov 83  }
  0x51   :  { %750 = vrot.lane.b32.xlu1 %v745_v25, %s1890_s17  ;;  %s1435_s17 = smov 80  }
  0x55   :  { %762 = vrot.lane.b32.xlu1 %v757_v26, %s1889_s18  ;;  %s1434_s18 = smov 95  }
  0x59   :  { %774 = vrot.lane.b32.xlu1 %v769_v27, %s1888_s19  ;;  %s1433_s19 = smov 94  }
  0x5d   :  { %786 = vrot.lane.b32.xlu1 %v781_v28, %s1887_s20  ;;  %s1432_s20 = smov 93  }
  0x61   :  { %798 = vrot.lane.b32.xlu1 %v793_v29, %s1878_s2  ;;  %s1882_s2 = smov 100  }
  0x65   :  { %810 = vrot.lane.b32.xlu1 %v805_v30, %s1879_s21  ;;  %s1883_s21 = smov 101  }
  0x69   :  { %630 = vrot.lane.b32.xlu1 %v625_v31, %s1419_s22 }
  0x6d   :  { %642 = vrot.lane.b32.xlu1 %v637_v32, %s1880_s23  ;;  %s1884_s23 = smov 102  }
  0x71   :  { %654 = vrot.lane.b32.xlu1 %v649_v33, %s1886_s25  ;;  %s1431_s25 = smov 92  }
  0x75   :  { %666 = vrot.lane.b32.xlu1 %v661_v34, %s1881_s26  ;;  %s1885_s26 = smov 103  }
  0x79   :  { %678 = vrot.lane.b32.xlu1 %v673_v35, %s1882_s2  ;;  %s1427_s2 = smov 88  }
  0x7b   :  { %v1586_v37 = vpop.permute.xlu1 %918 }
  0x7d   :  { %690 = vrot.lane.b32.xlu1 %v685_v36, %s1883_s21  ;;  %s1428_s21 = smov 89  }
  0x7f   :  { %v1589_v39 = vpop.permute.xlu1 %930 }
  0x81   :  { %702 = vrot.lane.b32.xlu1 %v697_v38, %s1884_s23  ;;  %s1429_s23 = smov 90  }
  0x83   :  { %v1592_v41 = vpop.permute.xlu1 %942 }
  0x85   :  { %714 = vrot.lane.b32.xlu1 %v709_v40, %s1885_s26  ;;  %s1430_s26 = smov 91  }
  0x87   :  { %v1595_v43 = vpop.permute.xlu1 %954 }
  0x89   :  { %534 = vrot.lane.b32.xlu1 %v529_v42, %s1427_s2 }
  0x8b   :  { %v1598_v45 = vpop.permute.xlu1 %966 }
  0x8d   :  { %546 = vrot.lane.b32.xlu1 %v541_v44, %s1428_s21 }
  0x8f   :  { %v1601_v47 = vpop.permute.xlu1 %978 }
  0x91   :  { %558 = vrot.lane.b32.xlu1 %v553_v46, %s1429_s23 }
  0x93   :  { %v1604_v49 = vpop.permute.xlu1 %990 }
  0x95   :  { %570 = vrot.lane.b32.xlu1 %v565_v48, %s1430_s26 }
  0x97   :  { %v1607_v51 = vpop.permute.xlu1 %1002 }
  0x99   :  { %582 = vrot.lane.b32.xlu1 %v577_v50, %s1431_s25 }
  0x9b   :  { %v1610_v53 = vpop.permute.xlu1 %822 }
  0x9d   :  { %594 = vrot.lane.b32.xlu1 %v589_v52, %s1432_s20 }
  0x9f   :  { %v1613_v55 = vpop.permute.xlu1 %834 }
  0xa1   :  { %606 = vrot.lane.b32.xlu1 %v601_v54, %s1433_s19 }
  0xa3   :  { %v1616_v57 = vpop.permute.xlu1 %846 }
  0xa5   :  { %618 = vrot.lane.b32.xlu1 %v613_v56, %s1434_s18 }
  0xa7   :  { %v1619_v59 = vpop.permute.xlu1 %858 }
  0xa9   :  { %438 = vrot.lane.b32.xlu1 %v433_v58, %s1435_s17 }
  0xab   :  { %v1622_v60 = vpop.permute.xlu1 %870 }
  0xaf   :  { %v1624_v61 = vpop.permute.xlu1 %882 }
  0xb3   :  { %v1626_v62 = vpop.permute.xlu1 %894 }
  0xb7   :  { %v1628_v63 = vpop.permute.xlu1 %906 }
  0xbb   :  { %v1630_v0 = vpop.permute.xlu1 %726 }
  0xbf   :  { %v1632_v1 = vpop.permute.xlu1 %738 }
  0xc3   :  { %v1634_v2 = vpop.permute.xlu1 %750 }
  0xc7   :  { %v1639_v10 = vpop.permute.xlu1 %762 }
  0xca   :  { %v1216_v5 = vpop.f32.mrf.mxu0 }
  0xcb   :  { %v126_v6 = vadd.f32 %v1216_v5, %v1169_v4  ;;  %v1648_v20 = vpop.permute.xlu1 %774 }
  0xcc   :  { %v117_v7 = vpop.f32.mrf.mxu0 }
  0xcd   :  { %v150_v8 = vmax.f32 %v126_v6, 0.0  ;;  %v118_v9 = vadd.f32 %v1169_v4, %v117_v7 }
  0xce   :  { %v1217_v11 = vpop.f32.mrf.mxu0 }
  0xcf   :  { %159 = vst.msk [vmem:[#allocation2 + $0x20] sm:$0xff] %vm156_vm1, %v150_v8  ;;  %v148_v12 = vmax.f32 %v118_v9, 0.0  ;;  %v129_v13 = vadd.f32 %v1217_v11, %v1169_v4  ;;  %v1659_v30 = vpop.permute.xlu1 %786 }
  0xd0   :  { %171 = vst.msk [vmem:[#allocation2 + $0x20] sm:$0xff] %vm166_vm3, %v1394_v3  ;;  %v120_v14 = vpop.f32.mrf.mxu0 }
  0xd1   :  { %157 = vst.msk [vmem:[#allocation2] sm:$0xff] %vm156_vm1, %v148_v12  ;;  %v151_v15 = vmax.f32 %v129_v13, 0.0  ;;  %v121_v16 = vadd.f32 %v1169_v4, %v120_v14 }
  0xd2   :  { %167 = vst.msk [vmem:[#allocation2] sm:$0xff] %vm166_vm3, %v1394_v3  ;;  %v1220_v17 = vpop.f32.mrf.mxu0 }
  0xd3   :  { %160 = vst.msk [vmem:[#allocation2 + $0x30] sm:$0xff] %vm156_vm1, %v151_v15  ;;  %v149_v18 = vmax.f32 %v121_v16, 0.0  ;;  %v142_v19 = vadd.f32 %v1220_v17, %v1169_v4  ;;  %v1669_v46 = vpop.permute.xlu1 %798  ;;  %v445_v15 = vld [vmem:[#allocation2 + $0x28] ss:$0 sm:$0xff]  ;;  %v457_v17 = vld [vmem:[#allocation2 + $0x29] ss:$0 sm:$0xff] }
  0xd4   :  { %173 = vst.msk [vmem:[#allocation2 + $0x30] sm:$0xff] %vm166_vm3, %v1394_v3  ;;  %v133_v21 = vpop.f32.mrf.mxu0 }
  0xd5   :  { %158 = vst.msk [vmem:[#allocation2 + $0x10] sm:$0xff] %vm156_vm1, %v149_v18  ;;  %v154_v22 = vmax.f32 %v142_v19, 0.0  ;;  %v134_v23 = vadd.f32 %v1169_v4, %v133_v21  ;;  %v469_v18 = vld [vmem:[#allocation2 + $0x2a] ss:$0 sm:$0xff]  ;;  %v481_v21 = vld [vmem:[#allocation2 + $0x2b] ss:$0 sm:$0xff] }
  0xd6   :  { %169 = vst.msk [vmem:[#allocation2 + $0x10] sm:$0xff] %vm166_vm3, %v1394_v3  ;;  %v1221_v24 = vpop.f32.mrf.mxu0 }
  0xd7   :  { %163 = vst.msk [vmem:[#allocation2 + $0x60] sm:$0xff] %vm156_vm1, %v154_v22  ;;  %v152_v25 = vmax.f32 %v134_v23, 0.0  ;;  %v145_v26 = vadd.f32 %v1221_v24, %v1169_v4  ;;  %v186_v27 = vld [vmem:[#allocation2 + $0x20] sm:$0xff]  ;;  %v1674_v5 = vpop.permute.xlu1 %810  ;;  %v493_v23 = vld [vmem:[#allocation2 + $0x2c] ss:$0 sm:$0xff] }
  0xd8   :  { %179 = vst.msk [vmem:[#allocation2 + $0x60] sm:$0xff] %vm166_vm3, %v1394_v3  ;;  %v136_v28 = vpop.f32.mrf.mxu0  ;;  %v204_v33 = vrot.slane %v186_v27, 1  ;;  %v505_v24 = vld [vmem:[#allocation2 + $0x2d] ss:$0 sm:$0xff] }
  0xd9   :  { %161 = vst.msk [vmem:[#allocation2 + $0x40] sm:$0xff] %vm156_vm1, %v152_v25  ;;  %v155_v29 = vmax.f32 %v145_v26, 0.0  ;;  %v184_v31 = vld [vmem:[#allocation2] sm:$0xfe]  ;;  %v137_v32 = vadd.f32 %v1169_v4, %v136_v28  ;;  %v517_v26 = vld [vmem:[#allocation2 + $0x2e] ss:$0 sm:$0xff] }
  0xda   :  { %175 = vst.msk [vmem:[#allocation2 + $0x40] sm:$0xff] %vm166_vm3, %v1394_v3  ;;  %v201_v38 = vrot.slane %v184_v31, 1  ;;  %v337_v28 = vld [vmem:[#allocation2 + $0xf] ss:$0 sm:$0xff] }
  0xdb   :  { %165 = vst.msk [vmem:[#allocation2 + $0x70] sm:$0x7f] %vm164_vm2, %v155_v29  ;;  %v187_v34 = vld [vmem:[#allocation2 + $0x30] sm:$0xff]  ;;  %v153_v35 = vmax.f32 %v137_v32, 0.0  ;;  %v1679_v13 = vpop.permute.xlu1 %630  ;;  %v349_v29 = vld [vmem:[#allocation2 + $0x18] ss:$0 sm:$0xff] }
  0xdc   :  { %182 = vst.msk [vmem:[#allocation2 + $0x70] sm:$0x7f] %vm181_vm4, %v1394_v3  ;;  %v206_v36 = vrot.slane %v187_v34, 1  ;;  %v361_v32 = vld [vmem:[#allocation2 + $0x19] ss:$0 sm:$0xff]  ;;  %vm344_vm2 = vcmask 588800  }
  0xdd   :  { %v185_v40 = vld [vmem:[#allocation2 + $0x10] sm:$0xff]  ;;  %162 = vst.msk [vmem:[#allocation2 + $0x50] sm:$0xff] %vm156_vm1, %v153_v35  ;;  %v373_v34 = vld [vmem:[#allocation2 + $0x1a] ss:$0 sm:$0xff]  ;;  %v385_v35 = vld [vmem:[#allocation2 + $0x1b] ss:$0 sm:$0xff] }
  0xde   :  { %v207_v42 = vsel %vm200_vm5, %v204_v33, %v206_v36  ;;  %v202_v44 = vrot.slane %v185_v40, 1  ;;  %177 = vst.msk [vmem:[#allocation2 + $0x50] sm:$0xff] %vm166_vm3, %v1394_v3  ;;  %vm440_vm1 = vcmask 654336   ;;  %vm356_vm3 = vcmask 596992  }
  0xdf   :  { %220 = vrot.lane.b32.xlu1 %v207_v42, %s1436_s3  ;;  %v190_v54 = vld [vmem:[#allocation2 + $0x60] sm:$0xff]  ;;  %v1682_v16 = vpop.permute.xlu1 %642  ;;  %v409_v42 = vld [vmem:[#allocation2 + $0x1d] ss:$0 sm:$0xff]  ;;  %vm368_vm4 = vcmask 605184  }
  0xe0   :  { %v205_v48 = vsel %vm200_vm5, %v202_v44, %v204_v33  ;;  %v203_v50 = vsel %vm200_vm5, %v201_v38, %v202_v44  ;;  %v212_v4 = vrot.slane %v190_v54, 1  ;;  %v397_v38 = vld [vmem:[#allocation2 + $0x1c] ss:$0 sm:$0xff]  ;;  %v421_v44 = vld [vmem:[#allocation2 + $0x1e] ss:$0 sm:$0xff] }
  0xe1   :  { %218 = vrot.lane.b32.xlu0 %v205_v48, %s1436_s3  ;;  %v188_v52 = vld [vmem:[#allocation2 + $0x40] sm:$0xff]  ;;  %v265_v54 = vld [vmem:[#allocation2 + $0x9] ss:$0 sm:$0xff] }
  0xe2   :  { %v208_v56 = vrot.slane %v188_v52, 1 }
  0xe3   :  { %v996_v58 = vld [vmem:[#allocation2 + $0x76] ss:$0 sm:$0xff]  ;;  %216 = vrot.lane.b32.xlu1 %v203_v50, %s1436_s3  ;;  %v1686_v19 = vpop.permute.xlu1 %654  ;;  %v253_v50 = vld [vmem:[#allocation2 + $0x8] ss:$0 sm:$0xff] }
  0xe4   :  { %v209_v6 = vsel %vm200_vm5, %v206_v36, %v208_v56  ;;  %v191_v7 = vld [vmem:[#allocation2 + $0x70] sm:$0x7f] }
  0xe5   :  { %1000 = vrot.lane.b32.xlu0 %v996_v58, %s1402_s6  ;;  %v189_v3 = vld [vmem:[#allocation2 + $0x50] sm:$0xff]  ;;  %v214_v11 = vrot.slane %v191_v7, 1  ;;  %s1437_s6 = smov 81  }
  0xe6   :  { %v210_v8 = vrot.slane %v189_v3, 1 }
  0xe7   :  { %v215_v14 = vsel %vm200_vm5, %v212_v4, %v214_v11  ;;  %v1689_v22 = vpop.permute.xlu1 %666 }
  0xe8   :  { %v213_v9 = vsel %vm200_vm5, %v210_v8, %v212_v4  ;;  %v211_v12 = vsel %vm200_vm5, %v208_v56, %v210_v8  ;;  %v277_v56 = vld [vmem:[#allocation2 + $0xa] ss:$0 sm:$0xff]  ;;  %vm380_vm5 = vcmask 613376  }
  0xe9   :  { %222 = vrot.lane.b32.xlu0 %v209_v6, %s1436_s3  ;;  %226 = vrot.lane.b32.xlu1 %v213_v9, %s1436_s3 }
  0xeb   :  { %v1693_v25 = vpop.permute.xlu1 %678 }
  0xed   :  { %230 = vrot.lane.b32.xlu0 %v214_v11, %s1436_s3  ;;  %224 = vrot.lane.b32.xlu1 %v211_v12, %s1436_s3 }
  0xef   :  { %v1696_v27 = vpop.permute.xlu1 %690 }
  0xf1   :  { %228 = vrot.lane.b32.xlu0 %v215_v14, %s1436_s3  ;;  %450 = vrot.lane.b32.xlu1 %v445_v15, %s1437_s6  ;;  %s1441_s3 = smov 85  }
  0xf3   :  { %v1700_v31 = vpop.permute.xlu1 %702 }
  0xf5   :  { %462 = vrot.lane.b32.xlu1 %v457_v17, %s1438_s15 }
  0xf7   :  { %v1703_v33 = vpop.permute.xlu1 %714 }
  0xf9   :  { %474 = vrot.lane.b32.xlu1 %v469_v18, %s1439_s16 }
  0xfb   :  { %v1707_v36 = vpop.permute.xlu1 %534 }
  0xfd   :  { %486 = vrot.lane.b32.xlu1 %v481_v21, %s1440_s7 }
  0xff   :  { %v1710_v40 = vpop.permute.xlu1 %546 }
 0x101   :  { %498 = vrot.lane.b32.xlu1 %v493_v23, %s1441_s3 }
 0x103   :  { %v1714_v48 = vpop.permute.xlu1 %558 }
 0x105   :  { %510 = vrot.lane.b32.xlu1 %v505_v24, %s1442_s14 }
 0x107   :  { %v1717_v52 = vpop.permute.xlu1 %570 }
 0x109   :  { %522 = vrot.lane.b32.xlu1 %v517_v26, %s1443_s13 }
 0x10b   :  { %v1721_v58 = vpop.permute.xlu1 %582 }
 0x10d   :  { %342 = vrot.lane.b32.xlu1 %v337_v28, %s1444_s12 }
 0x10f   :  { %v1724_v4 = vpop.permute.xlu1 %594 }
 0x111   :  { %354 = vrot.lane.b32.xlu1 %v349_v29, %s1445_s11 }
 0x113   :  { %v1726_v3 = vpop.permute.xlu1 %606 }
 0x115   :  { %366 = vrot.lane.b32.xlu1 %v361_v32, %s1446_s10 }
 0x117   :  { %v1728_v6 = vpop.permute.xlu1 %618 }
 0x119   :  { %378 = vrot.lane.b32.xlu1 %v373_v34, %s1447_s9 }
 0x11b   :  { %v1730_v7 = vpop.permute.xlu1 %438 }
 0x11d   :  { %390 = vrot.lane.b32.xlu1 %v385_v35, %s1448_s8 }
 0x121   :  { %402 = vrot.lane.b32.xlu1 %v397_v38, %s1449_s24 }
 0x125   :  { %414 = vrot.lane.b32.xlu1 %v409_v42, %s1450_s5 }
 0x129   :  { %426 = vrot.lane.b32.xlu1 %v421_v44, %s1451_s30 }
 0x12d   :  { %258 = vrot.lane.b32.xlu1 %v253_v50, %s1452_s29 }
 0x131   :  { %270 = vrot.lane.b32.xlu1 %v265_v54, %s1453_s0 }
 0x135   :  { %282 = vrot.lane.b32.xlu1 %v277_v56, %s1454_s28 }
 0x151   :  { %v221_v8 = vpop.permute.xlu1 %220 }
 0x152   :  { %243 = vst.msk [vmem:[#allocation2 + $0x20] sm:$0xff] %vm240_vm6, %v221_v8 }
 0x153   :  { %v219_v9 = vpop.permute.xlu0 %218 }
 0x154   :  { %242 = vst.msk [vmem:[#allocation2 + $0x10] sm:$0xff] %vm240_vm6, %v219_v9 }
 0x155   :  { %v217_v11 = vpop.permute.xlu1 %216 }
 0x156   :  { %241 = vst.msk [vmem:[#allocation2] sm:$0xff] %vm240_vm6, %v217_v11 }
 0x157   :  { %v1001_v12 = vpop.permute.xlu0 %1000 }
 0x158   :  { %v1005_v14 = vsel %vm1004_vm7, %v1001_v12, %v1607_v51  ;;  %vm404_vm7 = vcmask 629760  }
 0x159   :  { %1007 = vst [vmem:[#allocation3 + $0x3f] sm:$0x1] %v1005_v14  ;;  %v528_v15 = vld [vmem:[#allocation2 + $0x27] ss:$0 sm:$0xff]  ;;  %v444_v21 = vld [vmem:[#allocation2 + $0x20] ss:$0 sm:$0xff] }
 0x15a   :  { %532 = vrot.lane.b32.xlu0 %v528_v15, %s1427_s2  ;;  %v456_v51 = vld [vmem:[#allocation2 + $0x21] ss:$0 sm:$0xff]  ;;  %v468_v29 = vld [vmem:[#allocation2 + $0x22] ss:$0 sm:$0xff]  ;;  %v480_v32 = vld [vmem:[#allocation2 + $0x23] ss:$0 sm:$0xff] }
 0x15b   :  { %v223_v17 = vpop.permute.xlu0 %222  ;;  %v227_v18 = vpop.permute.xlu1 %226  ;;  %v492_v34 = vld [vmem:[#allocation2 + $0x24] ss:$0 sm:$0xff]  ;;  %v504_v35 = vld [vmem:[#allocation2 + $0x25] ss:$0 sm:$0xff]  ;;  %v516_v38 = vld [vmem:[#allocation2 + $0x26] ss:$0 sm:$0xff] }
 0x15c   :  { %244 = vst.msk [vmem:[#allocation2 + $0x30] sm:$0xff] %vm240_vm6, %v223_v17  ;;  %246 = vst.msk [vmem:[#allocation2 + $0x50] sm:$0xff] %vm240_vm6, %v227_v18  ;;  %v432_v42 = vld [vmem:[#allocation2 + $0x17] ss:$0 sm:$0xff]  ;;  %v348_v50 = vld [vmem:[#allocation2 + $0x10] ss:$0 sm:$0xff] }
 0x15d   :  { %v250_v23 = vld [vmem:[#allocation2] ss:$0 sm:$0xff]  ;;  %v336_v44 = vld [vmem:[#allocation2 + $0x7] ss:$0 sm:$0xff]  ;;  %v360_v54 = vld [vmem:[#allocation2 + $0x11] ss:$0 sm:$0xff] }
 0x15e   :  { %448 = vrot.lane.b32.xlu0 %v444_v21, %s1437_s6  ;;  %251 = vst [vmem:[#allocation3] sm:$0x1] %v250_v23  ;;  %v372_v56 = vld [vmem:[#allocation2 + $0x12] ss:$0 sm:$0xff]  ;;  %v384_v8 = vld [vmem:[#allocation2 + $0x13] ss:$0 sm:$0xff] }
 0x15f   :  { %v231_v24 = vpop.permute.xlu0 %230  ;;  %v225_v26 = vpop.permute.xlu1 %224  ;;  %v396_v9 = vld [vmem:[#allocation2 + $0x14] ss:$0 sm:$0xff]  ;;  %v408_v11 = vld [vmem:[#allocation2 + $0x15] ss:$0 sm:$0xff]  ;;  %v420_v12 = vld [vmem:[#allocation2 + $0x16] ss:$0 sm:$0xff] }
 0x160   :  { %249 = vst.msk [vmem:[#allocation2 + $0x70] sm:$0x3f] %vm248_vm8, %v231_v24  ;;  %v264_v14 = vld [vmem:[#allocation2 + $0x1] ss:$0 sm:$0xff]  ;;  %v276_v15 = vld [vmem:[#allocation2 + $0x2] ss:$0 sm:$0xff] }
 0x161   :  { %245 = vst.msk [vmem:[#allocation2 + $0x40] sm:$0xff] %vm240_vm6, %v225_v26  ;;  %vm416_vm8 = vcmask 637952   ;;  %s1922_s2 = smov 105   ;;  %s1928_s6 = smov 111  }
 0x162   :  { %460 = vrot.lane.b32.xlu0 %v456_v51, %s1438_s15  ;;  %s1929_s15 = smov 97  }
 0x163   :  { %v229_v28 = vpop.permute.xlu0 %228  ;;  %v624_v17 = vld [vmem:[#allocation2 + $0x37] ss:$0 sm:$0xff]  ;;  %v540_v18 = vld [vmem:[#allocation2 + $0x30] ss:$0 sm:$0xff]  ;;  %v552_v21 = vld [vmem:[#allocation2 + $0x31] ss:$0 sm:$0xff]  ;;  %v451_v24 = vpop.permute.xlu1 %450 }
 0x164   :  { %247 = vst.msk [vmem:[#allocation2 + $0x60] sm:$0xff] %vm240_vm6, %v229_v28  ;;  %v564_v26 = vld [vmem:[#allocation2 + $0x32] ss:$0 sm:$0xff]  ;;  %v576_v51 = vld [vmem:[#allocation2 + $0x33] ss:$0 sm:$0xff]  ;;  %vm392_vm6 = vcmask 621568  }
 0x165   :  { %v588_v28 = vld [vmem:[#allocation2 + $0x34] ss:$0 sm:$0xff] }
 0x166   :  { %472 = vrot.lane.b32.xlu0 %v468_v29, %s1439_s16  ;;  %s1930_s16 = smov 98  }
 0x16a   :  { %484 = vrot.lane.b32.xlu0 %v480_v32, %s1440_s7  ;;  %v600_v32 = vld [vmem:[#allocation2 + $0x35] ss:$0 sm:$0xff]  ;;  %s1910_s7 = smov 125  }
 0x16e   :  { %496 = vrot.lane.b32.xlu0 %v492_v34, %s1441_s3  ;;  %v289_v34 = vld [vmem:[#allocation2 + $0xb] ss:$0 sm:$0xff]  ;;  %s1931_s3 = smov 99  }
 0x172   :  { %508 = vrot.lane.b32.xlu0 %v504_v35, %s1442_s14  ;;  %s1917_s14 = smov 117  }
 0x176   :  { %520 = vrot.lane.b32.xlu0 %v516_v38, %s1443_s13  ;;  %v612_v38 = vld [vmem:[#allocation2 + $0x36] ss:$0 sm:$0xff]  ;;  %s1916_s13 = smov 116  }
 0x17a   :  { %436 = vrot.lane.b32.xlu0 %v432_v42, %s1435_s17  ;;  %v301_v42 = vld [vmem:[#allocation2 + $0xc] ss:$0 sm:$0xff]  ;;  %s1918_s17 = smov 118  }
 0x17e   :  { %340 = vrot.lane.b32.xlu0 %v336_v44, %s1444_s12  ;;  %v924_v44 = vld [vmem:[#allocation2 + $0x70] ss:$0 sm:$0xff]  ;;  %s1915_s12 = smov 115  }
 0x182   :  { %352 = vrot.lane.b32.xlu0 %v348_v50, %s1445_s11  ;;  %s1914_s11 = smov 114  }
 0x186   :  { %364 = vrot.lane.b32.xlu0 %v360_v54, %s1446_s10  ;;  %v313_v54 = vld [vmem:[#allocation2 + $0xd] ss:$0 sm:$0xff]  ;;  %s1913_s10 = smov 113  }
 0x18a   :  { %376 = vrot.lane.b32.xlu0 %v372_v56, %s1447_s9  ;;  %s1912_s9 = smov 120  }
 0x18e   :  { %388 = vrot.lane.b32.xlu0 %v384_v8, %s1448_s8  ;;  %s1911_s8 = smov 126  }
 0x192   :  { %400 = vrot.lane.b32.xlu0 %v396_v9, %s1449_s24  ;;  %s1455_s24 = smov 68   ;;  %v936_v9 = vld [vmem:[#allocation2 + $0x71] ss:$0 sm:$0xff] }
 0x193   :  { %294 = vrot.lane.b32.xlu1 %v289_v34, %s1455_s24 }
 0x196   :  { %412 = vrot.lane.b32.xlu0 %v408_v11, %s1450_s5  ;;  %v325_v11 = vld [vmem:[#allocation2 + $0xe] ss:$0 sm:$0xff]  ;;  %s1909_s5 = smov 124  }
 0x19a   :  { %424 = vrot.lane.b32.xlu0 %v420_v12, %s1451_s30  ;;  %s1458_s30 = smov 71  }
 0x19e   :  { %256 = vrot.lane.b32.xlu0 %v250_v23, %s1452_s29  ;;  %v463_v23 = vpop.permute.xlu1 %462  ;;  %s1907_s29 = smov 122  }
 0x1a2   :  { %268 = vrot.lane.b32.xlu0 %v264_v14, %s1453_s0  ;;  %v475_v29 = vpop.permute.xlu1 %474  ;;  %s1457_s0 = smov 70  }
 0x1a6   :  { %280 = vrot.lane.b32.xlu0 %v276_v15, %s1454_s28  ;;  %v487_v35 = vpop.permute.xlu1 %486  ;;  %s1456_s28 = smov 69  }
 0x1a7   :  { %306 = vrot.lane.b32.xlu1 %v301_v42, %s1456_s28  ;;  %v984_v42 = vld [vmem:[#allocation2 + $0x75] ss:$0 sm:$0xff] }
 0x1aa   :  { %628 = vrot.lane.b32.xlu0 %v624_v17, %s1419_s22  ;;  %v499_v50 = vpop.permute.xlu1 %498  ;;  %v948_v17 = vld [vmem:[#allocation2 + $0x72] ss:$0 sm:$0xff]  ;;  %s1924_s22 = smov 107  }
 0x1ab   :  { %318 = vrot.lane.b32.xlu1 %v313_v54, %s1457_s0 }
 0x1ae   :  { %544 = vrot.lane.b32.xlu0 %v540_v18, %s1428_s21  ;;  %v511_v14 = vpop.permute.xlu1 %510  ;;  %s1923_s21 = smov 106  }
 0x1af   :  { %330 = vrot.lane.b32.xlu1 %v325_v11, %s1458_s30 }
 0x1b2   :  { %556 = vrot.lane.b32.xlu0 %v552_v21, %s1429_s23  ;;  %s1925_s23 = smov 108  }
 0x1b6   :  { %568 = vrot.lane.b32.xlu0 %v564_v26, %s1430_s26  ;;  %v523_v26 = vpop.permute.xlu1 %522  ;;  %s1927_s26 = smov 110  }
 0x1ba   :  { %580 = vrot.lane.b32.xlu0 %v576_v51, %s1431_s25  ;;  %s1926_s25 = smov 109  }
 0x1be   :  { %592 = vrot.lane.b32.xlu0 %v588_v28, %s1432_s20  ;;  %s1921_s20 = smov 104  }
 0x1c2   :  { %604 = vrot.lane.b32.xlu0 %v600_v32, %s1433_s19  ;;  %v972_v32 = vld [vmem:[#allocation2 + $0x74] ss:$0 sm:$0xff]  ;;  %s1920_s19 = smov 112  }
 0x1c6   :  { %616 = vrot.lane.b32.xlu0 %v612_v38, %s1434_s18  ;;  %s1919_s18 = smov 119  }
 0x1ca   :  { %928 = vrot.lane.b32.xlu0 %v924_v44, %s1396_s27  ;;  %s1908_s27 = smov 123  }
 0x1cc   :  { %v533_v56 = vpop.permute.xlu0 %532 }
 0x1cd   :  { %v537_v8 = vsel %vm536_vm9, %v533_v56, %v1707_v36  ;;  %v960_v36 = vld [vmem:[#allocation2 + $0x73] ss:$0 sm:$0xff]  ;;  %v912_v56 = vld [vmem:[#allocation2 + $0x67] ss:$0 sm:$0xff]  ;;  %vm428_vm9 = vcmask 646144  }
 0x1ce   :  { %539 = vst [vmem:[#allocation3 + $0x18] sm:$0x1] %v537_v8  ;;  %940 = vrot.lane.b32.xlu0 %v936_v9, %s1907_s29  ;;  %v828_v9 = vld [vmem:[#allocation2 + $0x60] ss:$0 sm:$0xff]  ;;  %s1932_s29 = smov 100  }
 0x1d0   :  { %v449_v12 = vpop.permute.xlu0 %448 }
 0x1d1   :  { %v453_v15 = vsel %vm452_vm10, %v449_v12, %v451_v24  ;;  %v343_v24 = vpop.permute.xlu1 %342  ;;  %vm260_vm10 = vcmask 531456  }
 0x1d2   :  { %455 = vst [vmem:[#allocation3 + $0x11] sm:$0x1] %v453_v15  ;;  %952 = vrot.lane.b32.xlu0 %v948_v17, %s1908_s27  ;;  %v840_v15 = vld [vmem:[#allocation2 + $0x61] ss:$0 sm:$0xff]  ;;  %s1933_s27 = smov 101  }
 0x1d4   :  { %v461_v18 = vpop.permute.xlu0 %460 }
 0x1d5   :  { %v465_v21 = vsel %vm464_vm11, %v461_v18, %v463_v23  ;;  %v355_v44 = vpop.permute.xlu1 %354  ;;  %vm272_vm11 = vcmask 539648  }
 0x1d6   :  { %467 = vst [vmem:[#allocation3 + $0x12] sm:$0x1] %v465_v21  ;;  %964 = vrot.lane.b32.xlu0 %v960_v36, %s1909_s5  ;;  %v852_v21 = vld [vmem:[#allocation2 + $0x62] ss:$0 sm:$0xff]  ;;  %s1934_s5 = smov 102  }
 0x1d8   :  { %v473_v51 = vpop.permute.xlu0 %472 }
 0x1d9   :  { %v477_v28 = vsel %vm476_vm12, %v473_v51, %v475_v29  ;;  %v864_v51 = vld [vmem:[#allocation2 + $0x63] ss:$0 sm:$0xff]  ;;  %vm284_vm12 = vcmask 547840  }
 0x1da   :  { %479 = vst [vmem:[#allocation3 + $0x13] sm:$0x1] %v477_v28  ;;  %976 = vrot.lane.b32.xlu0 %v972_v32, %s1910_s7  ;;  %s1935_s7 = smov 103  }
 0x1dc   :  { %v485_v34 = vpop.permute.xlu0 %484 }
 0x1dd   :  { %v489_v38 = vsel %vm488_vm13, %v485_v34, %v487_v35  ;;  %v367_v35 = vpop.permute.xlu1 %366  ;;  %v876_v34 = vld [vmem:[#allocation2 + $0x64] ss:$0 sm:$0xff]  ;;  %vm632_vm13 = vcmask 785408  }
 0x1de   :  { %491 = vst [vmem:[#allocation3 + $0x14] sm:$0x1] %v489_v38  ;;  %988 = vrot.lane.b32.xlu0 %v984_v42, %s1911_s8 }
 0x1e0   :  { %v497_v23 = vpop.permute.xlu0 %496 }
 0x1e1   :  { %v501_v54 = vsel %vm500_vm14, %v497_v23, %v499_v50  ;;  %v379_v17 = vpop.permute.xlu1 %378  ;;  %v888_v23 = vld [vmem:[#allocation2 + $0x65] ss:$0 sm:$0xff]  ;;  %vm548_vm14 = vcmask 728064  }
 0x1e2   :  { %503 = vst [vmem:[#allocation3 + $0x15] sm:$0x1] %v501_v54  ;;  %916 = vrot.lane.b32.xlu0 %v912_v56, %s1912_s9  ;;  %v900_v56 = vld [vmem:[#allocation2 + $0x66] ss:$0 sm:$0xff] }
 0x1e4   :  { %v509_v29 = vpop.permute.xlu0 %508 }
 0x1e5   :  { %v513_v8 = vsel %vm512_vm15, %v509_v29, %v511_v14  ;;  %v816_v29 = vld [vmem:[#allocation2 + $0x57] ss:$0 sm:$0xff]  ;;  %vm560_vm15 = vcmask 736256  }
 0x1e6   :  { %515 = vst [vmem:[#allocation3 + $0x16] sm:$0x1] %v513_v8  ;;  %832 = vrot.lane.b32.xlu0 %v828_v9, %s1913_s10 }
 0x1e8   :  { %v521_v11 = vpop.permute.xlu0 %520 }
 0x1e9   :  { %v525_v12 = vsel %vm524_vm0, %v521_v11, %v523_v26  ;;  %v391_v26 = vpop.permute.xlu1 %390  ;;  %vm572_vm0 = vcmask 744448  }
 0x1ea   :  { %527 = vst [vmem:[#allocation3 + $0x17] sm:$0x1] %v525_v12  ;;  %844 = vrot.lane.b32.xlu0 %v840_v15, %s1914_s11 }
 0x1ec   :  { %v437_v50 = vpop.permute.xlu0 %436 }
 0x1ed   :  { %v441_v18 = vsel %vm440_vm1, %v437_v50, %v1730_v7  ;;  %v403_v38 = vpop.permute.xlu1 %402  ;;  %vm584_vm1 = vcmask 752640  }
 0x1ee   :  { %443 = vst [vmem:[#allocation3 + $0x10] sm:$0x1] %v441_v18  ;;  %856 = vrot.lane.b32.xlu0 %v852_v21, %s1915_s12  ;;  %v732_v18 = vld [vmem:[#allocation2 + $0x50] ss:$0 sm:$0xff] }
 0x1f0   :  { %v341_v14 = vpop.permute.xlu0 %340 }
 0x1f1   :  { %v345_v36 = vsel %vm344_vm2, %v341_v14, %v343_v24  ;;  %vm596_vm2 = vcmask 760832  }
 0x1f2   :  { %347 = vst [vmem:[#allocation3 + $0x8] sm:$0x1] %v345_v36  ;;  %868 = vrot.lane.b32.xlu0 %v864_v51, %s1916_s13  ;;  %v744_v51 = vld [vmem:[#allocation2 + $0x51] ss:$0 sm:$0xff] }
 0x1f4   :  { %v353_v28 = vpop.permute.xlu0 %352 }
 0x1f5   :  { %v357_v32 = vsel %vm356_vm3, %v353_v28, %v355_v44  ;;  %v415_v44 = vpop.permute.xlu1 %414  ;;  %vm608_vm3 = vcmask 769024  }
 0x1f6   :  { %359 = vst [vmem:[#allocation3 + $0x9] sm:$0x1] %v357_v32  ;;  %880 = vrot.lane.b32.xlu0 %v876_v34, %s1917_s14  ;;  %v756_v34 = vld [vmem:[#allocation2 + $0x52] ss:$0 sm:$0xff] }
 0x1f8   :  { %v365_v7 = vpop.permute.xlu0 %364 }
 0x1f9   :  { %v369_v42 = vsel %vm368_vm4, %v365_v7, %v367_v35  ;;  %v720_v35 = vld [vmem:[#allocation2 + $0x47] ss:$0 sm:$0xff]  ;;  %v427_v12 = vpop.permute.xlu1 %426  ;;  %vm620_vm4 = vcmask 777216  }
 0x1fa   :  { %371 = vst [vmem:[#allocation3 + $0xa] sm:$0x1] %v369_v42  ;;  %892 = vrot.lane.b32.xlu0 %v888_v23, %s1918_s17  ;;  %v768_v42 = vld [vmem:[#allocation2 + $0x53] ss:$0 sm:$0xff] }
 0x1fc   :  { %v377_v24 = vpop.permute.xlu0 %376 }
 0x1fd   :  { %v381_v54 = vsel %vm380_vm5, %v377_v24, %v379_v17  ;;  %v259_v21 = vpop.permute.xlu1 %258  ;;  %vm932_vm5 = vcmask 990208  }
 0x1fe   :  { %383 = vst [vmem:[#allocation3 + $0xb] sm:$0x1] %v381_v54  ;;  %904 = vrot.lane.b32.xlu0 %v900_v56, %s1919_s18  ;;  %v780_v56 = vld [vmem:[#allocation2 + $0x54] ss:$0 sm:$0xff] }
 0x200   :  { %v389_v8 = vpop.permute.xlu0 %388 }
 0x201   :  { %v393_v9 = vsel %vm392_vm6, %v389_v8, %v391_v26  ;;  %v271_v28 = vpop.permute.xlu1 %270  ;;  %v792_v8 = vld [vmem:[#allocation2 + $0x55] ss:$0 sm:$0xff]  ;;  %vm944_vm6 = vcmask 998400  }
 0x202   :  { %395 = vst [vmem:[#allocation3 + $0xc] sm:$0x1] %v393_v9  ;;  %820 = vrot.lane.b32.xlu0 %v816_v29, %s1920_s19 }
 0x204   :  { %v401_v11 = vpop.permute.xlu0 %400 }
 0x205   :  { %v405_v15 = vsel %vm404_vm7, %v401_v11, %v403_v38  ;;  %v283_v23 = vpop.permute.xlu1 %282  ;;  %v804_v11 = vld [vmem:[#allocation2 + $0x56] ss:$0 sm:$0xff]  ;;  %vm956_vm7 = vcmask 1006592  }
 0x206   :  { %407 = vst [vmem:[#allocation3 + $0xd] sm:$0x1] %v405_v15  ;;  %724 = vrot.lane.b32.xlu0 %v720_v35, %s1921_s20 }
 0x208   :  { %v413_v50 = vpop.permute.xlu0 %412 }
 0x209   :  { %v417_v17 = vsel %vm416_vm8, %v413_v50, %v415_v44  ;;  %v636_v50 = vld [vmem:[#allocation2 + $0x40] ss:$0 sm:$0xff]  ;;  %vm968_vm8 = vcmask 1014784  }
 0x20a   :  { %419 = vst [vmem:[#allocation3 + $0xe] sm:$0x1] %v417_v17  ;;  %736 = vrot.lane.b32.xlu0 %v732_v18, %s1922_s2  ;;  %v648_v18 = vld [vmem:[#allocation2 + $0x41] ss:$0 sm:$0xff] }
 0x20c   :  { %v425_v14 = vpop.permute.xlu0 %424 }
 0x20d   :  { %v429_v36 = vsel %vm428_vm9, %v425_v14, %v427_v12  ;;  %v660_v14 = vld [vmem:[#allocation2 + $0x42] ss:$0 sm:$0xff]  ;;  %vm980_vm9 = vcmask 1022976  }
 0x20e   :  { %431 = vst [vmem:[#allocation3 + $0xf] sm:$0x1] %v429_v36  ;;  %748 = vrot.lane.b32.xlu0 %v744_v51, %s1923_s21  ;;  %v672_v51 = vld [vmem:[#allocation2 + $0x43] ss:$0 sm:$0xff]  ;;  %s1459_s21 = smov [#allocation4]  }
 0x210   :  { %v257_v26 = vpop.permute.xlu0 %256 }
 0x211   :  { %v261_v32 = vsel %vm260_vm10, %v257_v26, %v259_v21  ;;  %vm992_vm10 = vcmask 1031168  }
 0x212   :  { %263 = vst [vmem:[#allocation3 + $0x1] sm:$0x1] %v261_v32  ;;  %760 = vrot.lane.b32.xlu0 %v756_v34, %s1924_s22  ;;  %v696_v34 = vld [vmem:[#allocation2 + $0x45] ss:$0 sm:$0xff]  ;;  %s1158_s22 = sshll.u32 %s1459_s21, 4  ;;  %s1159_s22 = int_to_ptr.vmem [resolvable:$true] %s1158_s22 }
 0x213   :  { %p1377_p1 = scmp.lt.s32.totalorder %s1159_s22, %s1159_s22 }
 0x214   :  { %v269_v7 = vpop.permute.xlu0 %268 }
 0x215   :  { %v273_v38 = vsel %vm272_vm11, %v269_v7, %v271_v28  ;;  %v684_v28 = vld [vmem:[#allocation2 + $0x44] ss:$0 sm:$0xff]  ;;  %vm920_vm11 = vcmask 982016  }
 0x216   :  { %275 = vst [vmem:[#allocation3 + $0x2] sm:$0x1] %v273_v38  ;;  %772 = vrot.lane.b32.xlu0 %v768_v42, %s1925_s23  ;;  %v708_v38 = vld [vmem:[#allocation2 + $0x46] ss:$0 sm:$0xff] }
 0x218   :  { %v281_v24 = vpop.permute.xlu0 %280 }
 0x219   :  { %v285_v54 = vsel %vm284_vm12, %v281_v24, %v283_v23  ;;  %v288_v23 = vld [vmem:[#allocation2 + $0x3] ss:$0 sm:$0xff]  ;;  %vm836_vm12 = vcmask 924672  }
 0x21a   :  { %287 = vst [vmem:[#allocation3 + $0x3] sm:$0x1] %v285_v54  ;;  %784 = vrot.lane.b32.xlu0 %v780_v56, %s1926_s25  ;;  %v300_v54 = vld [vmem:[#allocation2 + $0x4] ss:$0 sm:$0xff] }
 0x21c   :  { %v629_v44 = vpop.permute.xlu0 %628 }
 0x21d   :  { %v633_v29 = vsel %vm632_vm13, %v629_v44, %v1679_v13  ;;  %v312_v44 = vld [vmem:[#allocation2 + $0x5] ss:$0 sm:$0xff]  ;;  %vm848_vm13 = vcmask 932864  }
 0x21e   :  { %635 = vst [vmem:[#allocation3 + $0x20] sm:$0x1] %v633_v29  ;;  %796 = vrot.lane.b32.xlu0 %v792_v8, %s1927_s26  ;;  %v324_v8 = vld [vmem:[#allocation2 + $0x6] ss:$0 sm:$0xff] }
 0x220   :  { %v545_v9 = vpop.permute.xlu0 %544 }
 0x221   :  { %v549_v35 = vsel %vm548_vm14, %v545_v9, %v1710_v40  ;;  %vm860_vm14 = vcmask 941056  }
 0x222   :  { %551 = vst [vmem:[#allocation3 + $0x19] sm:$0x1] %v549_v35  ;;  %808 = vrot.lane.b32.xlu0 %v804_v11, %s1928_s6  ;;  %v1016_v35 = vld [vmem:[%s1874_s1] sm:$0xff] }
 0x223   :  { %1254 = vmatprep.mubr.f32.mxu0 %v1016_v35  ;;  %v1026_v35 = vld [vmem:[#allocation3 + $0x10] sm:$0xff] }
 0x224   :  { %v557_v12 = vpop.permute.xlu0 %556 }
 0x225   :  { %v561_v15 = vsel %vm560_vm15, %v557_v12, %v1714_v48  ;;  %vm872_vm15 = vcmask 949248  }
 0x226   :  { %563 = vst [vmem:[#allocation3 + $0x1a] sm:$0x1] %v561_v15  ;;  %640 = vrot.lane.b32.xlu0 %v636_v50, %s1929_s15 }
 0x228   :  { %v569_v13 = vpop.permute.xlu0 %568 }
 0x229   :  { %v573_v17 = vsel %vm572_vm0, %v569_v13, %v1717_v52  ;;  %vm884_vm0 = vcmask 957440  }
 0x22a   :  { %575 = vst [vmem:[#allocation3 + $0x1b] sm:$0x1] %v573_v17  ;;  %652 = vrot.lane.b32.xlu0 %v648_v18, %s1930_s16 }
 0x22c   :  { %v581_v40 = vpop.permute.xlu0 %580 }
 0x22d   :  { %v585_v21 = vsel %vm584_vm1, %v581_v40, %v1721_v58  ;;  %vm896_vm1 = vcmask 965632  }
 0x22e   :  { %587 = vst [vmem:[#allocation3 + $0x1c] sm:$0x1] %v585_v21  ;;  %664 = vrot.lane.b32.xlu0 %v660_v14, %s1931_s3 }
 0x230   :  { %v593_v48 = vpop.permute.xlu0 %592 }
 0x231   :  { %v597_v36 = vsel %vm596_vm2, %v593_v48, %v1724_v4  ;;  %vm908_vm2 = vcmask 973824  }
 0x232   :  { %599 = vst [vmem:[#allocation3 + $0x1d] sm:$0x1] %v597_v36  ;;  %676 = vrot.lane.b32.xlu0 %v672_v51, %s1932_s29 }
 0x234   :  { %v605_v52 = vpop.permute.xlu0 %604 }
 0x235   :  { %v609_v26 = vsel %vm608_vm3, %v605_v52, %v1726_v3  ;;  %vm824_vm3 = vcmask 916480  }
 0x236   :  { %611 = vst [vmem:[#allocation3 + $0x1e] sm:$0x1] %v609_v26  ;;  %688 = vrot.lane.b32.xlu0 %v684_v28, %s1933_s27 }
 0x238   :  { %v617_v58 = vpop.permute.xlu0 %616 }
 0x239   :  { %v621_v32 = vsel %vm620_vm4, %v617_v58, %v1728_v6  ;;  %vm728_vm4 = vcmask 850944  }
 0x23a   :  { %623 = vst [vmem:[#allocation3 + $0x1f] sm:$0x1] %v621_v32  ;;  %700 = vrot.lane.b32.xlu0 %v696_v34, %s1934_s5 }
 0x23c   :  { %v929_v4 = vpop.permute.xlu0 %928 }
 0x23d   :  { %v933_v7 = vsel %vm932_vm5, %v929_v4, %v1589_v39  ;;  %vm740_vm5 = vcmask 859136  }
 0x23e   :  { %935 = vst [vmem:[#allocation3 + $0x39] sm:$0x1] %v933_v7  ;;  %712 = vrot.lane.b32.xlu0 %v708_v38, %s1935_s7 }
 0x240   :  { %v941_v3 = vpop.permute.xlu0 %940 }
 0x241   :  { %v945_v42 = vsel %vm944_vm6, %v941_v3, %v1592_v41  ;;  %v1018_v41 = vld [vmem:[%s1874_s1 + $0x10] sm:$0xff]  ;;  %vm752_vm6 = vcmask 867328  }
 0x242   :  { %947 = vst [vmem:[#allocation3 + $0x3a] sm:$0x1] %v945_v42  ;;  %292 = vrot.lane.b32.xlu0 %v288_v23, %s1455_s24  ;;  %1257 = vmatprep.mubr.f32.mxu1 %v1018_v41 }
 0x244   :  { %v953_v6 = vpop.permute.xlu0 %952 }
 0x245   :  { %v957_v24 = vsel %vm956_vm7, %v953_v6, %v1595_v43  ;;  %vm764_vm7 = vcmask 875520  }
 0x246   :  { %959 = vst [vmem:[#allocation3 + $0x3b] sm:$0x1] %v957_v24  ;;  %304 = vrot.lane.b32.xlu0 %v300_v54, %s1456_s28  ;;  %v295_v54 = vpop.permute.xlu1 %294 }
 0x248   :  { %v965_v39 = vpop.permute.xlu0 %964 }
 0x249   :  { %v969_v56 = vsel %vm968_vm8, %v965_v39, %v1598_v45  ;;  %vm776_vm8 = vcmask 883712  }
 0x24a   :  { %971 = vst [vmem:[#allocation3 + $0x3c] sm:$0x1] %v969_v56  ;;  %316 = vrot.lane.b32.xlu0 %v312_v44, %s1457_s0  ;;  %v307_v44 = vpop.permute.xlu1 %306 }
 0x24c   :  { %v977_v29 = vpop.permute.xlu0 %976 }
 0x24d   :  { %v981_v43 = vsel %vm980_vm9, %v977_v29, %v1601_v47  ;;  %vm788_vm9 = vcmask 891904  }
 0x24e   :  { %983 = vst [vmem:[#allocation3 + $0x3d] sm:$0x1] %v981_v43  ;;  %328 = vrot.lane.b32.xlu0 %v324_v8, %s1458_s30 }
 0x250   :  { %v989_v9 = vpop.permute.xlu0 %988 }
 0x251   :  { %v993_v45 = vsel %vm992_vm10, %v989_v9, %v1604_v49  ;;  %vm800_vm10 = vcmask 900096  }
 0x252   :  { %995 = vst [vmem:[#allocation3 + $0x3e] sm:$0x1] %v993_v45 }
 0x254   :  { %v917_v11 = vpop.permute.xlu0 %916 }
 0x255   :  { %v921_v12 = vsel %vm920_vm11, %v917_v11, %v1586_v37  ;;  %vm812_vm11 = vcmask 908288  }
 0x256   :  { %923 = vst [vmem:[#allocation3 + $0x38] sm:$0x1] %v921_v12 }
 0x258   :  { %v833_v47 = vpop.permute.xlu0 %832 }
 0x259   :  { %v837_v15 = vsel %vm836_vm12, %v833_v47, %v1613_v55  ;;  %vm644_vm12 = vcmask 793600   ;;  %v1025_v47 = vld [vmem:[#allocation3 + $0x8] sm:$0xff] }
 0x25a   :  { %839 = vst [vmem:[#allocation3 + $0x31] sm:$0x1] %v837_v15 }
 0x25c   :  { %v845_v50 = vpop.permute.xlu0 %844 }
 0x25d   :  { %v849_v49 = vsel %vm848_vm13, %v845_v50, %v1616_v57  ;;  %v1031_v13 = vld [vmem:[#allocation3 + $0x38] sm:$0xff]  ;;  %vm656_vm13 = vcmask 801792  }
 0x25e   :  { %851 = vst [vmem:[#allocation3 + $0x32] sm:$0x1] %v849_v49  ;;  %1238 = vmatprep.subr.mxu0 %v1031_v13  ;;  %1274 = vmatprep.subr.mxu1 %v1031_v13  ;;  %v1019_v50 = vld [vmem:[%s1874_s1 + $0x18] sm:$0xff]  ;;  %v1017_v49 = vld [vmem:[%s1874_s1 + $0x8] sm:$0xff] }
 0x25f   :  { %1239 = vmatpush3.xpose.msra.mxu0 %v1031_v13  ;;  %1290 = vmatpush3.xpose.msra.mxu1 %v1031_v13  ;;  %v1020_v13 = vld [vmem:[%s1874_s1 + $0x20] sm:$0xff] }
 0x260   :  { %v857_v17 = vpop.permute.xlu0 %856 }
 0x261   :  { %v861_v37 = vsel %vm860_vm14, %v857_v17, %v1619_v59  ;;  %vm668_vm14 = vcmask 809984   ;;  %v1021_v17 = vld [vmem:[%s1874_s1 + $0x28] sm:$0xff] }
 0x262   :  { %863 = vst [vmem:[#allocation3 + $0x33] sm:$0x1] %v861_v37  ;;  %v1022_v37 = vld [vmem:[%s1874_s1 + $0x30] sm:$0xff] }
 0x264   :  { %v869_v18 = vpop.permute.xlu0 %868 }
 0x265   :  { %v873_v55 = vsel %vm872_vm15, %v869_v18, %v1622_v60  ;;  %vm680_vm15 = vcmask 818176   ;;  %v1023_v18 = vld [vmem:[%s1874_s1 + $0x38] sm:$0x7f]  ;;  %s1372_s1 = scalar_lea.vmem %s1159_s22, 1024 }
 0x266   :  { %875 = vst [vmem:[#allocation3 + $0x34] sm:$0x1] %v873_v55  ;;  %p1373_p0 = scmp.ne.s32.totalorder %s1159_s22, %s1372_s1  ;;  %p1378_p2 = scmp.lt.s32.totalorder %s1372_s1, %s1372_s1 }
 0x268   :  { %v881_v40 = vpop.permute.xlu0 %880  ;;  %p1379_p3 = por %p1378_p2, %p1377_p1 }
 0x269   :  { %v885_v57 = vsel %vm884_vm0, %v881_v40, %v1624_v61  ;;  %vm692_vm0 = vcmask 826368  }
 0x26a   :  { %887 = vst [vmem:[#allocation3 + $0x35] sm:$0x1] %v885_v57  ;;  %p1380_p4 = pnand %p1379_p3, %p1373_p0 }
 0x26c   :  { %v893_v21 = vpop.permute.xlu0 %892 }
 0x26d   :  { %v897_v14 = vsel %vm896_vm1, %v893_v21, %v1626_v62  ;;  %vm704_vm1 = vcmask 834560  }
 0x26e   :  { %899 = vst [vmem:[#allocation3 + $0x36] sm:$0x1] %v897_v14 }
 0x270   :  { %v905_v48 = vpop.permute.xlu0 %904 }
 0x271   :  { %v909_v59 = vsel %vm908_vm2, %v905_v48, %v1628_v63  ;;  %vm716_vm2 = vcmask 842752  }
 0x272   :  { %911 = vst [vmem:[#allocation3 + $0x37] sm:$0x1] %v909_v59 }
 0x274   :  { %v821_v36 = vpop.permute.xlu0 %820 }
 0x275   :  { %v825_v60 = vsel %vm824_vm3, %v821_v36, %v1610_v53  ;;  %vm296_vm3 = vcmask 556032  }
 0x276   :  { %827 = vst [vmem:[#allocation3 + $0x30] sm:$0x1] %v825_v60 }
 0x278   :  { %v725_v51 = vpop.permute.xlu0 %724 }
 0x279   :  { %v729_v61 = vsel %vm728_vm4, %v725_v51, %v1630_v0  ;;  %vm308_vm4 = vcmask 564224  }
 0x27a   :  { %731 = vst [vmem:[#allocation3 + $0x28] sm:$0x1] %v729_v61 }
 0x27c   :  { %v737_v52 = vpop.permute.xlu0 %736 }
 0x27d   :  { %v741_v62 = vsel %vm740_vm5, %v737_v52, %v1632_v1  ;;  %v1030_v26 = vld [vmem:[#allocation3 + $0x30] sm:$0xff]  ;;  %vm320_vm5 = vcmask 572416  }
 0x27e   :  { %743 = vst [vmem:[#allocation3 + $0x29] sm:$0x1] %v741_v62  ;;  %1240 = vmatprep.subr.mxu0 %v1030_v26  ;;  %1275 = vmatprep.subr.mxu1 %v1030_v26 }
 0x27f   :  { %1241 = vmatpush3.xpose.msra.mxu0 %v1030_v26  ;;  %1291 = vmatpush3.xpose.msra.mxu1 %v1030_v26 }
 0x280   :  { %v749_v63 = vpop.permute.xlu0 %748 }
 0x281   :  { %v753_v53 = vsel %vm752_vm6, %v749_v63, %v1634_v2  ;;  %vm332_vm6 = vcmask 580608  }
 0x282   :  { %755 = vst [vmem:[#allocation3 + $0x2a] sm:$0x1] %v753_v53 }
 0x284   :  { %v761_v28 = vpop.permute.xlu0 %760 }
 0x285   :  { %v765_v0 = vsel %vm764_vm7, %v761_v28, %v1639_v10 }
 0x286   :  { %767 = vst [vmem:[#allocation3 + $0x2b] sm:$0x1] %v765_v0 }
 0x288   :  { %v773_v58 = vpop.permute.xlu0 %772 }
 0x289   :  { %v777_v1 = vsel %vm776_vm8, %v773_v58, %v1648_v20 }
 0x28a   :  { %779 = vst [vmem:[#allocation3 + $0x2c] sm:$0x1] %v777_v1 }
 0x28c   :  { %v785_v32 = vpop.permute.xlu0 %784 }
 0x28d   :  { %v789_v34 = vsel %vm788_vm9, %v785_v32, %v1659_v30 }
 0x28e   :  { %791 = vst [vmem:[#allocation3 + $0x2d] sm:$0x1] %v789_v34 }
 0x290   :  { %v797_v4 = vpop.permute.xlu0 %796 }
 0x291   :  { %v801_v2 = vsel %vm800_vm10, %v797_v4, %v1669_v46 }
 0x292   :  { %803 = vst [vmem:[#allocation3 + $0x2e] sm:$0x1] %v801_v2 }
 0x294   :  { %v809_v7 = vpop.permute.xlu0 %808 }
 0x295   :  { %v813_v10 = vsel %vm812_vm11, %v809_v7, %v1674_v5 }
 0x296   :  { %815 = vst [vmem:[#allocation3 + $0x2f] sm:$0x1] %v813_v10 }
 0x298   :  { %v641_v38 = vpop.permute.xlu0 %640 }
 0x299   :  { %v645_v20 = vsel %vm644_vm12, %v641_v38, %v1682_v16 }
 0x29a   :  { %647 = vst [vmem:[#allocation3 + $0x21] sm:$0x1] %v645_v20 }
 0x29c   :  { %v653_v3 = vpop.permute.xlu0 %652 }
 0x29d   :  { %v657_v30 = vsel %vm656_vm13, %v653_v3, %v1686_v19  ;;  %v1029_v42 = vld [vmem:[#allocation3 + $0x28] sm:$0xff] }
 0x29e   :  { %659 = vst [vmem:[#allocation3 + $0x22] sm:$0x1] %v657_v30  ;;  %1242 = vmatprep.subr.mxu0 %v1029_v42  ;;  %1276 = vmatprep.subr.mxu1 %v1029_v42 }
 0x29f   :  { %1243 = vmatpush3.xpose.msra.mxu0 %v1029_v42  ;;  %1292 = vmatpush3.xpose.msra.mxu1 %v1029_v42 }
 0x2a0   :  { %v665_v46 = vpop.permute.xlu0 %664 }
 0x2a1   :  { %v669_v5 = vsel %vm668_vm14, %v665_v46, %v1689_v22 }
 0x2a2   :  { %671 = vst [vmem:[#allocation3 + $0x23] sm:$0x1] %v669_v5 }
 0x2a4   :  { %v677_v23 = vpop.permute.xlu0 %676 }
 0x2a5   :  { %v681_v16 = vsel %vm680_vm15, %v677_v23, %v1693_v25 }
 0x2a6   :  { %683 = vst [vmem:[#allocation3 + $0x24] sm:$0x1] %v681_v16 }
 0x2a8   :  { %v689_v6 = vpop.permute.xlu0 %688 }
 0x2a9   :  { %v693_v19 = vsel %vm692_vm0, %v689_v6, %v1696_v27  ;;  %v319_v27 = vpop.permute.xlu1 %318 }
 0x2aa   :  { %695 = vst [vmem:[#allocation3 + $0x25] sm:$0x1] %v693_v19 }
 0x2ac   :  { %v701_v24 = vpop.permute.xlu0 %700 }
 0x2ad   :  { %v705_v39 = vsel %vm704_vm1, %v701_v24, %v1700_v31  ;;  %v1027_v31 = vld [vmem:[#allocation3 + $0x18] sm:$0xff]  ;;  %v331_v45 = vpop.permute.xlu1 %330 }
 0x2ae   :  { %707 = vst [vmem:[#allocation3 + $0x26] sm:$0x1] %v705_v39 }
 0x2b0   :  { %v713_v56 = vpop.permute.xlu0 %712 }
 0x2b1   :  { %v717_v22 = vsel %vm716_vm2, %v713_v56, %v1703_v33 }
 0x2b2   :  { %719 = vst [vmem:[#allocation3 + $0x27] sm:$0x1] %v717_v22 }
 0x2b4   :  { %v293_v25 = vpop.permute.xlu0 %292 }
 0x2b5   :  { %v297_v41 = vsel %vm296_vm3, %v293_v25, %v295_v54 }
 0x2b6   :  { %299 = vst [vmem:[#allocation3 + $0x4] sm:$0x1] %v297_v41 }
 0x2b8   :  { %v305_v29 = vpop.permute.xlu0 %304 }
 0x2b9   :  { %v309_v43 = vsel %vm308_vm4, %v305_v29, %v307_v44  ;;  %v1028_v8 = vld [vmem:[#allocation3 + $0x20] sm:$0xff] }
 0x2ba   :  { %311 = vst [vmem:[#allocation3 + $0x5] sm:$0x1] %v309_v43  ;;  %1244 = vmatprep.subr.mxu0 %v1028_v8  ;;  %1277 = vmatprep.subr.mxu1 %v1028_v8 }
 0x2bb   :  { %1245 = vmatpush3.xpose.msra.mxu0 %v1028_v8  ;;  %1293 = vmatpush3.xpose.msra.mxu1 %v1028_v8 }
 0x2bc   :  { %1246 = vmatprep.subr.mxu0 %v1027_v31  ;;  %1278 = vmatprep.subr.mxu1 %v1027_v31  ;;  %v317_v33 = vpop.permute.xlu0 %316 }
 0x2bd   :  { %v321_v9 = vsel %vm320_vm5, %v317_v33, %v319_v27 }
 0x2be   :  { %323 = vst [vmem:[#allocation3 + $0x6] sm:$0x1] %v321_v9 }
 0x2bf   :  { %1247 = vmatpush3.xpose.msra.mxu0 %v1027_v31  ;;  %1294 = vmatpush3.xpose.msra.mxu1 %v1027_v31 }
 0x2c0   :  { %v329_v11 = vpop.permute.xlu0 %328  ;;  %1248 = vmatprep.subr.mxu0 %v1026_v35  ;;  %1279 = vmatprep.subr.mxu1 %v1026_v35 }
 0x2c1   :  { %v333_v12 = vsel %vm332_vm6, %v329_v11, %v331_v45 }
 0x2c2   :  { %335 = vst [vmem:[#allocation3 + $0x7] sm:$0x1] %v333_v12 }
 0x2c3   :  { %1249 = vmatpush3.xpose.msra.mxu0 %v1026_v35  ;;  %1295 = vmatpush3.xpose.msra.mxu1 %v1026_v35 }
 0x2c4   :  { %1250 = vmatprep.subr.mxu0 %v1025_v47  ;;  %1280 = vmatprep.subr.mxu1 %v1025_v47 }
 0x2c7   :  { %1251 = vmatpush3.xpose.msra.mxu0 %v1025_v47  ;;  %1296 = vmatpush3.xpose.msra.mxu1 %v1025_v47 }
 0x2c9   :  { %v1024_v15 = vld [vmem:[#allocation3] sm:$0xff] }
 0x2ca   :  { %1252 = vmatprep.subr.mxu0 %v1024_v15  ;;  %1281 = vmatprep.subr.mxu1 %v1024_v15 }
 0x2cb   :  { %1253 = vmatpush3.xpose.msra.mxu0 %v1024_v15  ;;  %1297 = vmatpush3.xpose.msra.mxu1 %v1024_v15 }
 0x2ce   :  { %1258 = vmatmul.mubr.f32.vlgmr.msra.gmra.mxu1 %v1019_v50  ;;  %1255 = vmatmul.mubr.f32.vlgmr.msra.gmra.mxu0 %v1017_v49 }
 0x2cf   :  { %1260 = vmatprep.mubr.f32.mxu1 %v1020_v13 }
 0x2d2   :  { %1261 = vmatmul.mubr.f32.gmra.mxu1 %v1021_v17 }
 0x2d3   :  { %1263 = vmatprep.mubr.f32.mxu1 %v1022_v37 }
 0x2d6   :  { %1264 = vmatmul.mubr.f32.gmra.mxu1 %v1023_v18 }
 0x38e   :  { %v1259_v55 = vpop.f32.mrf.mxu1  ;;  %v1256_v40 = vpop.f32.mrf.mxu0 }
 0x38f   :  { %1148 = vst [vmem:[#allocation4 + $0x18] sm:$0xff] %v1259_v55  ;;  %1146 = vst [vmem:[#allocation4 + $0x8] sm:$0xff] %v1256_v40 }
 0x390   :  { %v1116_v57 = vpop.f32.mrf.mxu1  ;;  %v1106_v21 = vpop.f32.mrf.mxu0 }
 0x391   :  { %1147 = vst [vmem:[#allocation4 + $0x10] sm:$0xff] %v1116_v57  ;;  %1145 = vst [vmem:[#allocation4] sm:$0xff] %v1106_v21 }
 0x392   :  { %v1262_v14 = vpop.f32.mrf.mxu1 }
 0x393   :  { %1150 = vst [vmem:[#allocation4 + $0x28] sm:$0xff] %v1262_v14 }
 0x394   :  { %v1126_v48 = vpop.f32.mrf.mxu1 }
 0x395   :  { %1149 = vst [vmem:[#allocation4 + $0x20] sm:$0xff] %v1126_v48 }
 0x396   :  { %v1265_v59 = vpop.f32.mrf.mxu1 }
 0x397   :  { %1152 = vst [vmem:[#allocation4 + $0x38] sm:$0x7f] %v1265_v59 }
 0x398   :  { %v1136_v36 = vpop.f32.mrf.mxu1 }
 0x399   :  { %1151 = vst [vmem:[#allocation4 + $0x30] sm:$0xff] %v1136_v36 }
 0x39a   :  { %1383 = shalt.err (!%p1380_p4)
}
 0x39b   :  { %s1460_s23 = smov 128   ;;  %s1461_s25 = smov 8  }
 0x39c   :  { %1164 = dma.vmem_to_hbm [thread:$0]  %s1159_s22, 1024, %s1877_s4, [#allocation5], %s1460_s23, %s1460_s23, %s1461_s25  }
 0x39d   :  { %1392 = dma.done.wait [#allocation5], 1024  }
 0x39e   :  { %1393 = vsyncadd [#allocation5], 4294966272 }
 0x39f   :  { %1168 = vsyncpa [#allocation5], 1 }

</bundles_post_ra>
